<compile_context>
chip_gen: v6e
topology: v6e:2x2x1
jax: 0.10.0
libtpu: 0.0.40
codegen_flags: <defaults>
</compile_context>

<pallas_src>
from functools import partial

import jax
import jax.numpy as jnp
from jax.experimental import pallas as pl
from jax.experimental.pallas import tpu as pltpu


_SEQ_FMA_MAX_S = 16   # unrolled scalar-FMA sequence layer up to this S


# ---------------------------------------------------------------------------
# Pallas kernel: full ReplicatorBlock forward for a block of TB batch elements.
# All math in (TB, S, E) layout; no transposes.
# ---------------------------------------------------------------------------
def _replicator_block_kernel(x_ref, w_emb_t_ref, w_seq_ref, o_ref, *,
                             seq_fma: bool, mask: bool):
    TB, S, E = x_ref.shape
    tiny = jnp.float32(jnp.finfo(jnp.float32).tiny)   # smallest normal f32

    x = x_ref[...]                                    # (TB, S, E) f32
    w_emb_t = w_emb_t_ref[...]                        # (E, E) == w_emb.T

    # ---- ReplicatorLayer over the embedding dim -----------------------------
    # fit1[r, m] = sum_n w_emb[m, n] * x[r, n]  ==  x_flat @ w_emb.T
    # One MXU matmul with M = TB*S.
    x_flat = x.reshape(TB * S, E)
    fit1 = jnp.dot(x_flat, w_emb_t, preferred_element_type=jnp.float32)
    avg1 = jnp.sum(x_flat * fit1, axis=-1, keepdims=True)         # (TB*S, 1)
    x1 = jnp.maximum(x_flat + x_flat * (fit1 - avg1), 0.0).reshape(TB, S, E)

    # ---- SwapProbSpaces #1, expressed in (S, E) layout -----------------------
    # Marginal over S per (b, e); reciprocal on the small marginal, then one
    # broadcast multiply.  0/0 -> 0 exactly (x1 == 0 wherever marg1 == 0).
    marg1 = jnp.sum(x1, axis=1, keepdims=True)                    # (TB, 1, E)
    inv1 = 1.0 / jnp.maximum(marg1, tiny)
    x2 = x1 * inv1                                                # (TB, S, E)

    # ---- ReplicatorLayer over the sequence dim ------------------------------
    if seq_fma:
        # Small S: unrolled scalar-broadcast FMAs; w_seq scalars read from SMEM.
        # When mask=True the zeroed upper-triangular terms are skipped.
        x2_rows = [x2[:, u, :] for u in range(S)]                 # each (TB, E)
        fit2_rows = []
        for s in range(S):
            upper = (s + 1) if mask else S
            acc = w_seq_ref[s, 0] * x2_rows[0]
            for u in range(1, upper):
                acc = acc + w_seq_ref[s, u] * x2_rows[u]
            fit2_rows.append(acc)                                 # (TB, E)

        # avg2[b, e] = sum_s x2[b, s, e] * fit2[b, s, e]
        avg2 = x2_rows[0] * fit2_rows[0]
        for s in range(1, S):
            avg2 = avg2 + x2_rows[s] * fit2_rows[s]               # (TB, E)

        # ---- SwapProbSpaces #2 ("transpose back" is a no-op in this layout) --
        for s in range(S):
            x2_s = x2_rows[s]
            x3_s = jnp.maximum(x2_s + x2_s * (fit2_rows[s] - avg2), 0.0)
            marg2_s = jnp.sum(x3_s, axis=-1, keepdims=True)       # (TB, 1)
            inv2_s = 1.0 / jnp.maximum(marg2_s, tiny)
            o_ref[:, s, :] = (x3_s * inv2_s).astype(o_ref.dtype)
    else:
        # Larger S: one non-batched MXU matmul in (S, TB*E) layout
        # (only taken when S > _SEQ_FMA_MAX_S; not exercised by the tests below).
        w_seq = w_seq_ref[...]                                    # (S, S) VMEM
        x2_wide = jnp.transpose(x2, (1, 0, 2)).reshape(S, TB * E)
        fit2 = jnp.dot(w_seq, x2_wide, preferred_element_type=jnp.float32)
        fit2 = jnp.transpose(fit2.reshape(S, TB, E), (1, 0, 2))   # (TB, S, E)
        avg2 = jnp.sum(x2 * fit2, axis=1, keepdims=True)          # (TB, 1, E)
        x3 = jnp.maximum(x2 + x2 * (fit2 - avg2), 0.0)
        marg2 = jnp.sum(x3, axis=-1, keepdims=True)               # (TB, S, 1)
        inv2 = 1.0 / jnp.maximum(marg2, tiny)
        o_ref[...] = (x3 * inv2).astype(o_ref.dtype)


# ---------------------------------------------------------------------------
# Wrapper: parameter prep (glue) + batch-block sizing + pallas_call
# ---------------------------------------------------------------------------
def _pick_block_b(B, S, E, *, itemsize=4, min_grid_steps=4,
                  vmem_budget_bytes=16 * 1024 * 1024):
    """Pick a batch block size TB.

    Keeps (a) >= min_grid_steps grid steps when B allows, so the Pallas
    pipeline overlaps DMA with compute and v7x's two TensorCores both get work
    on the "parallel" batch axis, and (b) ~14 live f32 (TB,S,E) slabs
    (2x double-buffered input block + 2x output block + ~10 intermediates)
    inside a conservative budget that leaves headroom under the 32 MiB
    vmem_limit passed to the compiler (v7x: 64 MiB physical; v5e/v6e: 128 MiB).
    """
    per_batch_bytes = 14 * S * E * itemsize
    cap_vmem = max(1, vmem_budget_bytes // max(per_batch_bytes, 1))
    cap_steps = max(1, B // min_grid_steps)
    tb = max(1, min(B, cap_vmem, cap_steps))
    while B % tb:
        tb -= 1
    return tb


def replicator_block(x, w_emb, w_seq, *, mask: bool = False, block_b=None,
                     vmem_budget_bytes=16 * 1024 * 1024,
                     vmem_limit_bytes=32 * 1024 * 1024):
    """x: (B, S, E) float32; w_emb: (E, E); w_seq: (S, S)."""
    B, S, E = x.shape
    assert w_emb.shape == (E, E) and w_seq.shape == (S, S)

    # Parameter prep happens once in XLA (not per grid step):
    if mask:
        # masked_fill(triu(ones, diagonal=1), 0) on the seq-space weight
        mask_matrix = jnp.triu(jnp.ones((S, S), dtype=bool), k=1)
        w_seq = jnp.where(mask_matrix, 0.0, w_seq)
    w_emb_t = jnp.transpose(w_emb)   # kernel contracts (TB*S,E)@(E,E) directly

    if block_b is None:
        block_b = _pick_block_b(B, S, E, vmem_budget_bytes=vmem_budget_bytes)
    grid = (B // block_b,)

    seq_fma = S <= _SEQ_FMA_MAX_S
    if seq_fma:
        # Tiny (S,S) weight read as scalars -> keep it in SMEM.
        w_seq_spec = pl.BlockSpec(memory_space=pltpu.MemorySpace.SMEM)
    else:
        w_seq_spec = pl.BlockSpec((S, S), lambda b: (0, 0))

    kernel = partial(_replicator_block_kernel, seq_fma=seq_fma, mask=mask)

    return pl.pallas_call(
        kernel,
        out_shape=jax.ShapeDtypeStruct((B, S, E), x.dtype),
        grid_spec=pltpu.PrefetchScalarGridSpec(
            num_scalar_prefetch=0,
            grid=grid,
            in_specs=[
                pl.BlockSpec((block_b, S, E), lambda b: (b, 0, 0)),
                pl.BlockSpec((E, E), lambda b: (0, 0)),   # weight stays resident
                w_seq_spec,
            ],
            out_specs=pl.BlockSpec((block_b, S, E), lambda b: (b, 0, 0)),
        ),
        compiler_params=pltpu.CompilerParams(
            dimension_semantics=("parallel",),
            vmem_limit_bytes=vmem_limit_bytes,
        ),
    )(x, w_emb_t, w_seq)


# ---------------------------------------------------------------------------
# Pure-JAX reference (mirrors the PyTorch module) for a correctness check
# ---------------------------------------------------------------------------
def _replicator_layer_ref(x, w):
    fit = jnp.einsum("mn,ijn->ijm", w, x)
    avg = jnp.einsum("ijm,ijm->ij", x, fit)[..., None]
    return jax.nn.relu(x + x * (fit - avg))


def _swap_prob_spaces_ref(x):
    x = jnp.swapaxes(x, -1, -2)
    marg = jnp.sum(x, axis=-1, keepdims=True)
    return jnp.nan_to_num(x / marg)


def replicator_block_ref(x, w_emb, w_seq, *, mask: bool = False):
    if mask:
        mask_matrix = jnp.triu(jnp.ones(w_seq.shape, dtype=bool), k=1)
        w_seq = jnp.where(mask_matrix, 0.0, w_seq)
    x = _replicator_layer_ref(x, w_emb)
    x = _swap_prob_spaces_ref(x)
    x = _replicator_layer_ref(x, w_seq)
    x = _swap_prob_spaces_ref(x)
    return x


# ---------------------------------------------------------------------------
# Deterministic parameter init (xavier_uniform equivalent)
# ---------------------------------------------------------------------------
def xavier_uniform(key, n):
    bound = (6.0 / (n + n)) ** 0.5
    return jax.random.uniform(key, (n, n), jnp.float32, minval=-bound, maxval=bound)


if __name__ == "__main__":
    key = jax.random.PRNGKey(0)

    # (batch, seq_len, embedding_size); second config exercises TB>1 and a
    # multi-step (4-step) "parallel" batch grid.
    for (B, S, E) in [(2, 8, 32), (16, 8, 32)]:
        kx, ke, ks, key = jax.random.split(key, 4)

        # Positive, normalized input (a probability-space over the embedding dim)
        x = jax.random.uniform(kx, (B, S, E), jnp.float32, minval=0.0, maxval=1.0)
        x = x / jnp.sum(x, axis=-1, keepdims=True)

        w_emb = xavier_uniform(ke, E)   # ReplicatorLayer(prob_space_size=E)
        w_seq = xavier_uniform(ks, S)   # ReplicatorLayer(prob_space_size=S, mask=...)

        for use_mask in (False, True):
            out = replicator_block(x, w_emb, w_seq, mask=use_mask)
            out = jax.block_until_ready(out)
            ref = replicator_block_ref(x, w_emb, w_seq, mask=use_mask)
            assert out.shape == (B, S, E)
            assert jnp.allclose(out, ref, atol=1e-5, rtol=1e-5), \
                f"mismatch vs reference (B={B}, mask={use_mask})"

    print("KERNEL_OK")
</pallas_src>

<mosaic_0001>
module attributes {stable_mosaic.version = 11 : i64} {
  func.func @_replicator_block_kernel(%arg0: i32, %arg1: memref<1x8x32xf32, #tpu.memory_space<vmem>>, %arg2: memref<32x32xf32, #tpu.memory_space<vmem>>, %arg3: memref<8x8xf32, #tpu.memory_space<smem>>, %arg4: memref<1x8x32xf32, #tpu.memory_space<vmem>>) attributes {dimension_semantics = [#tpu.dimension_semantics<parallel>], iteration_bounds = array<i64: 2>, scalar_prefetch = 0 : i64, scratch_operands = 0 : i64, tpu.core_type = #tpu.core_type<tc>, window_params = [{transform_indices = @transform_0, window_bounds = array<i64: 1, 8, 32>}, {pipeline_mode = #tpu.pipeline_mode<synchronous>, transform_indices = @transform_1, window_bounds = array<i64: 32, 32>}, {transform_indices = @transform_2, window_bounds = array<i64: 8, 8>}, {transform_indices = @transform_3, window_bounds = array<i64: 1, 8, 32>}]} {
    %c0 = arith.constant 0 : index
    %c0_0 = arith.constant 0 : index
    %c0_1 = arith.constant 0 : index
    %0 = vector.load %arg1[%c0, %c0_0, %c0_1] : memref<1x8x32xf32, #tpu.memory_space<vmem>>, vector<1x8x32xf32>
    %c0_2 = arith.constant 0 : index
    %c0_3 = arith.constant 0 : index
    %1 = vector.load %arg2[%c0_2, %c0_3] : memref<32x32xf32, #tpu.memory_space<vmem>>, vector<32x32xf32>
    %2 = vector.shape_cast %0 : vector<1x8x32xf32> to vector<8x32xf32>
    %cst = arith.constant dense<0.000000e+00> : vector<8x32xf32>
    %3 = tpu.matmul %2, %1, %cst {dimension_numbers = #tpu.dot_dimension_numbers<[1], [0], [0], [1], [0, 0, 1, 1], [], []>} : vector<8x32xf32>, vector<32x32xf32>, vector<8x32xf32> -> vector<8x32xf32>
    %4 = arith.mulf %2, %3 : vector<8x32xf32>
    %cst_4 = arith.constant dense<0.000000e+00> : vector<8xf32>
    %5 = vector.multi_reduction <add>, %4, %cst_4 [1] : vector<8x32xf32> to vector<8xf32>
    %6 = vector.shape_cast %5 : vector<8xf32> to vector<8x1xf32>
    %7 = vector.broadcast %6 : vector<8x1xf32> to vector<8x32xf32>
    %8 = arith.subf %3, %7 : vector<8x32xf32>
    %9 = arith.mulf %2, %8 : vector<8x32xf32>
    %10 = arith.addf %2, %9 : vector<8x32xf32>
    %cst_5 = arith.constant 0.000000e+00 : f32
    %11 = vector.broadcast %cst_5 : f32 to vector<8x32xf32>
    %12 = arith.maximumf %10, %11 : vector<8x32xf32>
    %13 = vector.shape_cast %12 : vector<8x32xf32> to vector<1x8x32xf32>
    %cst_6 = arith.constant dense<0.000000e+00> : vector<1x32xf32>
    %14 = vector.multi_reduction <add>, %13, %cst_6 [1] : vector<1x8x32xf32> to vector<1x32xf32>
    %15 = vector.shape_cast %14 : vector<1x32xf32> to vector<1x1x32xf32>
    %cst_7 = arith.constant 1.17549435E-38 : f32
    %16 = vector.broadcast %cst_7 : f32 to vector<1x1x32xf32>
    %17 = arith.maximumf %15, %16 : vector<1x1x32xf32>
    %cst_8 = arith.constant 1.000000e+00 : f32
    %18 = vector.broadcast %cst_8 : f32 to vector<1x1x32xf32>
    %19 = arith.divf %18, %17 : vector<1x1x32xf32>
    %20 = vector.broadcast %19 : vector<1x1x32xf32> to vector<1x8x32xf32>
    %21 = arith.mulf %13, %20 : vector<1x8x32xf32>
    %22 = vector.extract_strided_slice %21 {offsets = [0, 0, 0], sizes = [1, 1, 32], strides = [1, 1, 1]} : vector<1x8x32xf32> to vector<1x1x32xf32>
    %23 = vector.shape_cast %22 : vector<1x1x32xf32> to vector<1x32xf32>
    %24 = vector.extract_strided_slice %21 {offsets = [0, 1, 0], sizes = [1, 1, 32], strides = [1, 1, 1]} : vector<1x8x32xf32> to vector<1x1x32xf32>
    %25 = vector.shape_cast %24 : vector<1x1x32xf32> to vector<1x32xf32>
    %26 = vector.extract_strided_slice %21 {offsets = [0, 2, 0], sizes = [1, 1, 32], strides = [1, 1, 1]} : vector<1x8x32xf32> to vector<1x1x32xf32>
    %27 = vector.shape_cast %26 : vector<1x1x32xf32> to vector<1x32xf32>
    %28 = vector.extract_strided_slice %21 {offsets = [0, 3, 0], sizes = [1, 1, 32], strides = [1, 1, 1]} : vector<1x8x32xf32> to vector<1x1x32xf32>
    %29 = vector.shape_cast %28 : vector<1x1x32xf32> to vector<1x32xf32>
    %30 = vector.extract_strided_slice %21 {offsets = [0, 4, 0], sizes = [1, 1, 32], strides = [1, 1, 1]} : vector<1x8x32xf32> to vector<1x1x32xf32>
    %31 = vector.shape_cast %30 : vector<1x1x32xf32> to vector<1x32xf32>
    %32 = vector.extract_strided_slice %21 {offsets = [0, 5, 0], sizes = [1, 1, 32], strides = [1, 1, 1]} : vector<1x8x32xf32> to vector<1x1x32xf32>
    %33 = vector.shape_cast %32 : vector<1x1x32xf32> to vector<1x32xf32>
    %34 = vector.extract_strided_slice %21 {offsets = [0, 6, 0], sizes = [1, 1, 32], strides = [1, 1, 1]} : vector<1x8x32xf32> to vector<1x1x32xf32>
    %35 = vector.shape_cast %34 : vector<1x1x32xf32> to vector<1x32xf32>
    %36 = vector.extract_strided_slice %21 {offsets = [0, 7, 0], sizes = [1, 1, 32], strides = [1, 1, 1]} : vector<1x8x32xf32> to vector<1x1x32xf32>
    %37 = vector.shape_cast %36 : vector<1x1x32xf32> to vector<1x32xf32>
    %c0_9 = arith.constant 0 : index
    %c0_10 = arith.constant 0 : index
    %38 = memref.load %arg3[%c0_9, %c0_10] : memref<8x8xf32, #tpu.memory_space<smem>>
    %39 = vector.broadcast %38 : f32 to vector<1x32xf32>
    %40 = arith.mulf %39, %23 : vector<1x32xf32>
    %c0_11 = arith.constant 0 : index
    %c1 = arith.constant 1 : index
    %41 = memref.load %arg3[%c0_11, %c1] : memref<8x8xf32, #tpu.memory_space<smem>>
    %42 = vector.broadcast %41 : f32 to vector<1x32xf32>
    %43 = arith.mulf %42, %25 : vector<1x32xf32>
    %44 = arith.addf %40, %43 : vector<1x32xf32>
    %c0_12 = arith.constant 0 : index
    %c2 = arith.constant 2 : index
    %45 = memref.load %arg3[%c0_12, %c2] : memref<8x8xf32, #tpu.memory_space<smem>>
    %46 = vector.broadcast %45 : f32 to vector<1x32xf32>
    %47 = arith.mulf %46, %27 : vector<1x32xf32>
    %48 = arith.addf %44, %47 : vector<1x32xf32>
    %c0_13 = arith.constant 0 : index
    %c3 = arith.constant 3 : index
    %49 = memref.load %arg3[%c0_13, %c3] : memref<8x8xf32, #tpu.memory_space<smem>>
    %50 = vector.broadcast %49 : f32 to vector<1x32xf32>
    %51 = arith.mulf %50, %29 : vector<1x32xf32>
    %52 = arith.addf %48, %51 : vector<1x32xf32>
    %c0_14 = arith.constant 0 : index
    %c4 = arith.constant 4 : index
    %53 = memref.load %arg3[%c0_14, %c4] : memref<8x8xf32, #tpu.memory_space<smem>>
    %54 = vector.broadcast %53 : f32 to vector<1x32xf32>
    %55 = arith.mulf %54, %31 : vector<1x32xf32>
    %56 = arith.addf %52, %55 : vector<1x32xf32>
    %c0_15 = arith.constant 0 : index
    %c5 = arith.constant 5 : index
    %57 = memref.load %arg3[%c0_15, %c5] : memref<8x8xf32, #tpu.memory_space<smem>>
    %58 = vector.broadcast %57 : f32 to vector<1x32xf32>
    %59 = arith.mulf %58, %33 : vector<1x32xf32>
    %60 = arith.addf %56, %59 : vector<1x32xf32>
    %c0_16 = arith.constant 0 : index
    %c6 = arith.constant 6 : index
    %61 = memref.load %arg3[%c0_16, %c6] : memref<8x8xf32, #tpu.memory_space<smem>>
    %62 = vector.broadcast %61 : f32 to vector<1x32xf32>
    %63 = arith.mulf %62, %35 : vector<1x32xf32>
    %64 = arith.addf %60, %63 : vector<1x32xf32>
    %c0_17 = arith.constant 0 : index
    %c7 = arith.constant 7 : index
    %65 = memref.load %arg3[%c0_17, %c7] : memref<8x8xf32, #tpu.memory_space<smem>>
    %66 = vector.broadcast %65 : f32 to vector<1x32xf32>
    %67 = arith.mulf %66, %37 : vector<1x32xf32>
    %68 = arith.addf %64, %67 : vector<1x32xf32>
    %c1_18 = arith.constant 1 : index
    %c0_19 = arith.constant 0 : index
    %69 = memref.load %arg3[%c1_18, %c0_19] : memref<8x8xf32, #tpu.memory_space<smem>>
    %70 = vector.broadcast %69 : f32 to vector<1x32xf32>
    %71 = arith.mulf %70, %23 : vector<1x32xf32>
    %c1_20 = arith.constant 1 : index
    %c1_21 = arith.constant 1 : index
    %72 = memref.load %arg3[%c1_20, %c1_21] : memref<8x8xf32, #tpu.memory_space<smem>>
    %73 = vector.broadcast %72 : f32 to vector<1x32xf32>
    %74 = arith.mulf %73, %25 : vector<1x32xf32>
    %75 = arith.addf %71, %74 : vector<1x32xf32>
    %c1_22 = arith.constant 1 : index
    %c2_23 = arith.constant 2 : index
    %76 = memref.load %arg3[%c1_22, %c2_23] : memref<8x8xf32, #tpu.memory_space<smem>>
    %77 = vector.broadcast %76 : f32 to vector<1x32xf32>
    %78 = arith.mulf %77, %27 : vector<1x32xf32>
    %79 = arith.addf %75, %78 : vector<1x32xf32>
    %c1_24 = arith.constant 1 : index
    %c3_25 = arith.constant 3 : index
    %80 = memref.load %arg3[%c1_24, %c3_25] : memref<8x8xf32, #tpu.memory_space<smem>>
    %81 = vector.broadcast %80 : f32 to vector<1x32xf32>
    %82 = arith.mulf %81, %29 : vector<1x32xf32>
    %83 = arith.addf %79, %82 : vector<1x32xf32>
    %c1_26 = arith.constant 1 : index
    %c4_27 = arith.constant 4 : index
    %84 = memref.load %arg3[%c1_26, %c4_27] : memref<8x8xf32, #tpu.memory_space<smem>>
    %85 = vector.broadcast %84 : f32 to vector<1x32xf32>
    %86 = arith.mulf %85, %31 : vector<1x32xf32>
    %87 = arith.addf %83, %86 : vector<1x32xf32>
    %c1_28 = arith.constant 1 : index
    %c5_29 = arith.constant 5 : index
    %88 = memref.load %arg3[%c1_28, %c5_29] : memref<8x8xf32, #tpu.memory_space<smem>>
    %89 = vector.broadcast %88 : f32 to vector<1x32xf32>
    %90 = arith.mulf %89, %33 : vector<1x32xf32>
    %91 = arith.addf %87, %90 : vector<1x32xf32>
    %c1_30 = arith.constant 1 : index
    %c6_31 = arith.constant 6 : index
    %92 = memref.load %arg3[%c1_30, %c6_31] : memref<8x8xf32, #tpu.memory_space<smem>>
    %93 = vector.broadcast %92 : f32 to vector<1x32xf32>
    %94 = arith.mulf %93, %35 : vector<1x32xf32>
    %95 = arith.addf %91, %94 : vector<1x32xf32>
    %c1_32 = arith.constant 1 : index
    %c7_33 = arith.constant 7 : index
    %96 = memref.load %arg3[%c1_32, %c7_33] : memref<8x8xf32, #tpu.memory_space<smem>>
    %97 = vector.broadcast %96 : f32 to vector<1x32xf32>
    %98 = arith.mulf %97, %37 : vector<1x32xf32>
    %99 = arith.addf %95, %98 : vector<1x32xf32>
    %c2_34 = arith.constant 2 : index
    %c0_35 = arith.constant 0 : index
    %100 = memref.load %arg3[%c2_34, %c0_35] : memref<8x8xf32, #tpu.memory_space<smem>>
    %101 = vector.broadcast %100 : f32 to vector<1x32xf32>
    %102 = arith.mulf %101, %23 : vector<1x32xf32>
    %c2_36 = arith.constant 2 : index
    %c1_37 = arith.constant 1 : index
    %103 = memref.load %arg3[%c2_36, %c1_37] : memref<8x8xf32, #tpu.memory_space<smem>>
    %104 = vector.broadcast %103 : f32 to vector<1x32xf32>
    %105 = arith.mulf %104, %25 : vector<1x32xf32>
    %106 = arith.addf %102, %105 : vector<1x32xf32>
    %c2_38 = arith.constant 2 : index
    %c2_39 = arith.constant 2 : index
    %107 = memref.load %arg3[%c2_38, %c2_39] : memref<8x8xf32, #tpu.memory_space<smem>>
    %108 = vector.broadcast %107 : f32 to vector<1x32xf32>
    %109 = arith.mulf %108, %27 : vector<1x32xf32>
    %110 = arith.addf %106, %109 : vector<1x32xf32>
    %c2_40 = arith.constant 2 : index
    %c3_41 = arith.constant 3 : index
    %111 = memref.load %arg3[%c2_40, %c3_41] : memref<8x8xf32, #tpu.memory_space<smem>>
    %112 = vector.broadcast %111 : f32 to vector<1x32xf32>
    %113 = arith.mulf %112, %29 : vector<1x32xf32>
    %114 = arith.addf %110, %113 : vector<1x32xf32>
    %c2_42 = arith.constant 2 : index
    %c4_43 = arith.constant 4 : index
    %115 = memref.load %arg3[%c2_42, %c4_43] : memref<8x8xf32, #tpu.memory_space<smem>>
    %116 = vector.broadcast %115 : f32 to vector<1x32xf32>
    %117 = arith.mulf %116, %31 : vector<1x32xf32>
    %118 = arith.addf %114, %117 : vector<1x32xf32>
    %c2_44 = arith.constant 2 : index
    %c5_45 = arith.constant 5 : index
    %119 = memref.load %arg3[%c2_44, %c5_45] : memref<8x8xf32, #tpu.memory_space<smem>>
    %120 = vector.broadcast %119 : f32 to vector<1x32xf32>
    %121 = arith.mulf %120, %33 : vector<1x32xf32>
    %122 = arith.addf %118, %121 : vector<1x32xf32>
    %c2_46 = arith.constant 2 : index
    %c6_47 = arith.constant 6 : index
    %123 = memref.load %arg3[%c2_46, %c6_47] : memref<8x8xf32, #tpu.memory_space<smem>>
    %124 = vector.broadcast %123 : f32 to vector<1x32xf32>
    %125 = arith.mulf %124, %35 : vector<1x32xf32>
    %126 = arith.addf %122, %125 : vector<1x32xf32>
    %c2_48 = arith.constant 2 : index
    %c7_49 = arith.constant 7 : index
    %127 = memref.load %arg3[%c2_48, %c7_49] : memref<8x8xf32, #tpu.memory_space<smem>>
    %128 = vector.broadcast %127 : f32 to vector<1x32xf32>
    %129 = arith.mulf %128, %37 : vector<1x32xf32>
    %130 = arith.addf %126, %129 : vector<1x32xf32>
    %c3_50 = arith.constant 3 : index
    %c0_51 = arith.constant 0 : index
    %131 = memref.load %arg3[%c3_50, %c0_51] : memref<8x8xf32, #tpu.memory_space<smem>>
    %132 = vector.broadcast %131 : f32 to vector<1x32xf32>
    %133 = arith.mulf %132, %23 : vector<1x32xf32>
    %c3_52 = arith.constant 3 : index
    %c1_53 = arith.constant 1 : index
    %134 = memref.load %arg3[%c3_52, %c1_53] : memref<8x8xf32, #tpu.memory_space<smem>>
    %135 = vector.broadcast %134 : f32 to vector<1x32xf32>
    %136 = arith.mulf %135, %25 : vector<1x32xf32>
    %137 = arith.addf %133, %136 : vector<1x32xf32>
    %c3_54 = arith.constant 3 : index
    %c2_55 = arith.constant 2 : index
    %138 = memref.load %arg3[%c3_54, %c2_55] : memref<8x8xf32, #tpu.memory_space<smem>>
    %139 = vector.broadcast %138 : f32 to vector<1x32xf32>
    %140 = arith.mulf %139, %27 : vector<1x32xf32>
    %141 = arith.addf %137, %140 : vector<1x32xf32>
    %c3_56 = arith.constant 3 : index
    %c3_57 = arith.constant 3 : index
    %142 = memref.load %arg3[%c3_56, %c3_57] : memref<8x8xf32, #tpu.memory_space<smem>>
    %143 = vector.broadcast %142 : f32 to vector<1x32xf32>
    %144 = arith.mulf %143, %29 : vector<1x32xf32>
    %145 = arith.addf %141, %144 : vector<1x32xf32>
    %c3_58 = arith.constant 3 : index
    %c4_59 = arith.constant 4 : index
    %146 = memref.load %arg3[%c3_58, %c4_59] : memref<8x8xf32, #tpu.memory_space<smem>>
    %147 = vector.broadcast %146 : f32 to vector<1x32xf32>
    %148 = arith.mulf %147, %31 : vector<1x32xf32>
    %149 = arith.addf %145, %148 : vector<1x32xf32>
    %c3_60 = arith.constant 3 : index
    %c5_61 = arith.constant 5 : index
    %150 = memref.load %arg3[%c3_60, %c5_61] : memref<8x8xf32, #tpu.memory_space<smem>>
    %151 = vector.broadcast %150 : f32 to vector<1x32xf32>
    %152 = arith.mulf %151, %33 : vector<1x32xf32>
    %153 = arith.addf %149, %152 : vector<1x32xf32>
    %c3_62 = arith.constant 3 : index
    %c6_63 = arith.constant 6 : index
    %154 = memref.load %arg3[%c3_62, %c6_63] : memref<8x8xf32, #tpu.memory_space<smem>>
    %155 = vector.broadcast %154 : f32 to vector<1x32xf32>
    %156 = arith.mulf %155, %35 : vector<1x32xf32>
    %157 = arith.addf %153, %156 : vector<1x32xf32>
    %c3_64 = arith.constant 3 : index
    %c7_65 = arith.constant 7 : index
    %158 = memref.load %arg3[%c3_64, %c7_65] : memref<8x8xf32, #tpu.memory_space<smem>>
    %159 = vector.broadcast %158 : f32 to vector<1x32xf32>
    %160 = arith.mulf %159, %37 : vector<1x32xf32>
    %161 = arith.addf %157, %160 : vector<1x32xf32>
    %c4_66 = arith.constant 4 : index
    %c0_67 = arith.constant 0 : index
    %162 = memref.load %arg3[%c4_66, %c0_67] : memref<8x8xf32, #tpu.memory_space<smem>>
    %163 = vector.broadcast %162 : f32 to vector<1x32xf32>
    %164 = arith.mulf %163, %23 : vector<1x32xf32>
    %c4_68 = arith.constant 4 : index
    %c1_69 = arith.constant 1 : index
    %165 = memref.load %arg3[%c4_68, %c1_69] : memref<8x8xf32, #tpu.memory_space<smem>>
    %166 = vector.broadcast %165 : f32 to vector<1x32xf32>
    %167 = arith.mulf %166, %25 : vector<1x32xf32>
    %168 = arith.addf %164, %167 : vector<1x32xf32>
    %c4_70 = arith.constant 4 : index
    %c2_71 = arith.constant 2 : index
    %169 = memref.load %arg3[%c4_70, %c2_71] : memref<8x8xf32, #tpu.memory_space<smem>>
    %170 = vector.broadcast %169 : f32 to vector<1x32xf32>
    %171 = arith.mulf %170, %27 : vector<1x32xf32>
    %172 = arith.addf %168, %171 : vector<1x32xf32>
    %c4_72 = arith.constant 4 : index
    %c3_73 = arith.constant 3 : index
    %173 = memref.load %arg3[%c4_72, %c3_73] : memref<8x8xf32, #tpu.memory_space<smem>>
    %174 = vector.broadcast %173 : f32 to vector<1x32xf32>
    %175 = arith.mulf %174, %29 : vector<1x32xf32>
    %176 = arith.addf %172, %175 : vector<1x32xf32>
    %c4_74 = arith.constant 4 : index
    %c4_75 = arith.constant 4 : index
    %177 = memref.load %arg3[%c4_74, %c4_75] : memref<8x8xf32, #tpu.memory_space<smem>>
    %178 = vector.broadcast %177 : f32 to vector<1x32xf32>
    %179 = arith.mulf %178, %31 : vector<1x32xf32>
    %180 = arith.addf %176, %179 : vector<1x32xf32>
    %c4_76 = arith.constant 4 : index
    %c5_77 = arith.constant 5 : index
    %181 = memref.load %arg3[%c4_76, %c5_77] : memref<8x8xf32, #tpu.memory_space<smem>>
    %182 = vector.broadcast %181 : f32 to vector<1x32xf32>
    %183 = arith.mulf %182, %33 : vector<1x32xf32>
    %184 = arith.addf %180, %183 : vector<1x32xf32>
    %c4_78 = arith.constant 4 : index
    %c6_79 = arith.constant 6 : index
    %185 = memref.load %arg3[%c4_78, %c6_79] : memref<8x8xf32, #tpu.memory_space<smem>>
    %186 = vector.broadcast %185 : f32 to vector<1x32xf32>
    %187 = arith.mulf %186, %35 : vector<1x32xf32>
    %188 = arith.addf %184, %187 : vector<1x32xf32>
    %c4_80 = arith.constant 4 : index
    %c7_81 = arith.constant 7 : index
    %189 = memref.load %arg3[%c4_80, %c7_81] : memref<8x8xf32, #tpu.memory_space<smem>>
    %190 = vector.broadcast %189 : f32 to vector<1x32xf32>
    %191 = arith.mulf %190, %37 : vector<1x32xf32>
    %192 = arith.addf %188, %191 : vector<1x32xf32>
    %c5_82 = arith.constant 5 : index
    %c0_83 = arith.constant 0 : index
    %193 = memref.load %arg3[%c5_82, %c0_83] : memref<8x8xf32, #tpu.memory_space<smem>>
    %194 = vector.broadcast %193 : f32 to vector<1x32xf32>
    %195 = arith.mulf %194, %23 : vector<1x32xf32>
    %c5_84 = arith.constant 5 : index
    %c1_85 = arith.constant 1 : index
    %196 = memref.load %arg3[%c5_84, %c1_85] : memref<8x8xf32, #tpu.memory_space<smem>>
    %197 = vector.broadcast %196 : f32 to vector<1x32xf32>
    %198 = arith.mulf %197, %25 : vector<1x32xf32>
    %199 = arith.addf %195, %198 : vector<1x32xf32>
    %c5_86 = arith.constant 5 : index
    %c2_87 = arith.constant 2 : index
    %200 = memref.load %arg3[%c5_86, %c2_87] : memref<8x8xf32, #tpu.memory_space<smem>>
    %201 = vector.broadcast %200 : f32 to vector<1x32xf32>
    %202 = arith.mulf %201, %27 : vector<1x32xf32>
    %203 = arith.addf %199, %202 : vector<1x32xf32>
    %c5_88 = arith.constant 5 : index
    %c3_89 = arith.constant 3 : index
    %204 = memref.load %arg3[%c5_88, %c3_89] : memref<8x8xf32, #tpu.memory_space<smem>>
    %205 = vector.broadcast %204 : f32 to vector<1x32xf32>
    %206 = arith.mulf %205, %29 : vector<1x32xf32>
    %207 = arith.addf %203, %206 : vector<1x32xf32>
    %c5_90 = arith.constant 5 : index
    %c4_91 = arith.constant 4 : index
    %208 = memref.load %arg3[%c5_90, %c4_91] : memref<8x8xf32, #tpu.memory_space<smem>>
    %209 = vector.broadcast %208 : f32 to vector<1x32xf32>
    %210 = arith.mulf %209, %31 : vector<1x32xf32>
    %211 = arith.addf %207, %210 : vector<1x32xf32>
    %c5_92 = arith.constant 5 : index
    %c5_93 = arith.constant 5 : index
    %212 = memref.load %arg3[%c5_92, %c5_93] : memref<8x8xf32, #tpu.memory_space<smem>>
    %213 = vector.broadcast %212 : f32 to vector<1x32xf32>
    %214 = arith.mulf %213, %33 : vector<1x32xf32>
    %215 = arith.addf %211, %214 : vector<1x32xf32>
    %c5_94 = arith.constant 5 : index
    %c6_95 = arith.constant 6 : index
    %216 = memref.load %arg3[%c5_94, %c6_95] : memref<8x8xf32, #tpu.memory_space<smem>>
    %217 = vector.broadcast %216 : f32 to vector<1x32xf32>
    %218 = arith.mulf %217, %35 : vector<1x32xf32>
    %219 = arith.addf %215, %218 : vector<1x32xf32>
    %c5_96 = arith.constant 5 : index
    %c7_97 = arith.constant 7 : index
    %220 = memref.load %arg3[%c5_96, %c7_97] : memref<8x8xf32, #tpu.memory_space<smem>>
    %221 = vector.broadcast %220 : f32 to vector<1x32xf32>
    %222 = arith.mulf %221, %37 : vector<1x32xf32>
    %223 = arith.addf %219, %222 : vector<1x32xf32>
    %c6_98 = arith.constant 6 : index
    %c0_99 = arith.constant 0 : index
    %224 = memref.load %arg3[%c6_98, %c0_99] : memref<8x8xf32, #tpu.memory_space<smem>>
    %225 = vector.broadcast %224 : f32 to vector<1x32xf32>
    %226 = arith.mulf %225, %23 : vector<1x32xf32>
    %c6_100 = arith.constant 6 : index
    %c1_101 = arith.constant 1 : index
    %227 = memref.load %arg3[%c6_100, %c1_101] : memref<8x8xf32, #tpu.memory_space<smem>>
    %228 = vector.broadcast %227 : f32 to vector<1x32xf32>
    %229 = arith.mulf %228, %25 : vector<1x32xf32>
    %230 = arith.addf %226, %229 : vector<1x32xf32>
    %c6_102 = arith.constant 6 : index
    %c2_103 = arith.constant 2 : index
    %231 = memref.load %arg3[%c6_102, %c2_103] : memref<8x8xf32, #tpu.memory_space<smem>>
    %232 = vector.broadcast %231 : f32 to vector<1x32xf32>
    %233 = arith.mulf %232, %27 : vector<1x32xf32>
    %234 = arith.addf %230, %233 : vector<1x32xf32>
    %c6_104 = arith.constant 6 : index
    %c3_105 = arith.constant 3 : index
    %235 = memref.load %arg3[%c6_104, %c3_105] : memref<8x8xf32, #tpu.memory_space<smem>>
    %236 = vector.broadcast %235 : f32 to vector<1x32xf32>
    %237 = arith.mulf %236, %29 : vector<1x32xf32>
    %238 = arith.addf %234, %237 : vector<1x32xf32>
    %c6_106 = arith.constant 6 : index
    %c4_107 = arith.constant 4 : index
    %239 = memref.load %arg3[%c6_106, %c4_107] : memref<8x8xf32, #tpu.memory_space<smem>>
    %240 = vector.broadcast %239 : f32 to vector<1x32xf32>
    %241 = arith.mulf %240, %31 : vector<1x32xf32>
    %242 = arith.addf %238, %241 : vector<1x32xf32>
    %c6_108 = arith.constant 6 : index
    %c5_109 = arith.constant 5 : index
    %243 = memref.load %arg3[%c6_108, %c5_109] : memref<8x8xf32, #tpu.memory_space<smem>>
    %244 = vector.broadcast %243 : f32 to vector<1x32xf32>
    %245 = arith.mulf %244, %33 : vector<1x32xf32>
    %246 = arith.addf %242, %245 : vector<1x32xf32>
    %c6_110 = arith.constant 6 : index
    %c6_111 = arith.constant 6 : index
    %247 = memref.load %arg3[%c6_110, %c6_111] : memref<8x8xf32, #tpu.memory_space<smem>>
    %248 = vector.broadcast %247 : f32 to vector<1x32xf32>
    %249 = arith.mulf %248, %35 : vector<1x32xf32>
    %250 = arith.addf %246, %249 : vector<1x32xf32>
    %c6_112 = arith.constant 6 : index
    %c7_113 = arith.constant 7 : index
    %251 = memref.load %arg3[%c6_112, %c7_113] : memref<8x8xf32, #tpu.memory_space<smem>>
    %252 = vector.broadcast %251 : f32 to vector<1x32xf32>
    %253 = arith.mulf %252, %37 : vector<1x32xf32>
    %254 = arith.addf %250, %253 : vector<1x32xf32>
    %c7_114 = arith.constant 7 : index
    %c0_115 = arith.constant 0 : index
    %255 = memref.load %arg3[%c7_114, %c0_115] : memref<8x8xf32, #tpu.memory_space<smem>>
    %256 = vector.broadcast %255 : f32 to vector<1x32xf32>
    %257 = arith.mulf %256, %23 : vector<1x32xf32>
    %c7_116 = arith.constant 7 : index
    %c1_117 = arith.constant 1 : index
    %258 = memref.load %arg3[%c7_116, %c1_117] : memref<8x8xf32, #tpu.memory_space<smem>>
    %259 = vector.broadcast %258 : f32 to vector<1x32xf32>
    %260 = arith.mulf %259, %25 : vector<1x32xf32>
    %261 = arith.addf %257, %260 : vector<1x32xf32>
    %c7_118 = arith.constant 7 : index
    %c2_119 = arith.constant 2 : index
    %262 = memref.load %arg3[%c7_118, %c2_119] : memref<8x8xf32, #tpu.memory_space<smem>>
    %263 = vector.broadcast %262 : f32 to vector<1x32xf32>
    %264 = arith.mulf %263, %27 : vector<1x32xf32>
    %265 = arith.addf %261, %264 : vector<1x32xf32>
    %c7_120 = arith.constant 7 : index
    %c3_121 = arith.constant 3 : index
    %266 = memref.load %arg3[%c7_120, %c3_121] : memref<8x8xf32, #tpu.memory_space<smem>>
    %267 = vector.broadcast %266 : f32 to vector<1x32xf32>
    %268 = arith.mulf %267, %29 : vector<1x32xf32>
    %269 = arith.addf %265, %268 : vector<1x32xf32>
    %c7_122 = arith.constant 7 : index
    %c4_123 = arith.constant 4 : index
    %270 = memref.load %arg3[%c7_122, %c4_123] : memref<8x8xf32, #tpu.memory_space<smem>>
    %271 = vector.broadcast %270 : f32 to vector<1x32xf32>
    %272 = arith.mulf %271, %31 : vector<1x32xf32>
    %273 = arith.addf %269, %272 : vector<1x32xf32>
    %c7_124 = arith.constant 7 : index
    %c5_125 = arith.constant 5 : index
    %274 = memref.load %arg3[%c7_124, %c5_125] : memref<8x8xf32, #tpu.memory_space<smem>>
    %275 = vector.broadcast %274 : f32 to vector<1x32xf32>
    %276 = arith.mulf %275, %33 : vector<1x32xf32>
    %277 = arith.addf %273, %276 : vector<1x32xf32>
    %c7_126 = arith.constant 7 : index
    %c6_127 = arith.constant 6 : index
    %278 = memref.load %arg3[%c7_126, %c6_127] : memref<8x8xf32, #tpu.memory_space<smem>>
    %279 = vector.broadcast %278 : f32 to vector<1x32xf32>
    %280 = arith.mulf %279, %35 : vector<1x32xf32>
    %281 = arith.addf %277, %280 : vector<1x32xf32>
    %c7_128 = arith.constant 7 : index
    %c7_129 = arith.constant 7 : index
    %282 = memref.load %arg3[%c7_128, %c7_129] : memref<8x8xf32, #tpu.memory_space<smem>>
    %283 = vector.broadcast %282 : f32 to vector<1x32xf32>
    %284 = arith.mulf %283, %37 : vector<1x32xf32>
    %285 = arith.addf %281, %284 : vector<1x32xf32>
    %286 = arith.mulf %23, %68 : vector<1x32xf32>
    %287 = arith.mulf %25, %99 : vector<1x32xf32>
    %288 = arith.addf %286, %287 : vector<1x32xf32>
    %289 = arith.mulf %27, %130 : vector<1x32xf32>
    %290 = arith.addf %288, %289 : vector<1x32xf32>
    %291 = arith.mulf %29, %161 : vector<1x32xf32>
    %292 = arith.addf %290, %291 : vector<1x32xf32>
    %293 = arith.mulf %31, %192 : vector<1x32xf32>
    %294 = arith.addf %292, %293 : vector<1x32xf32>
    %295 = arith.mulf %33, %223 : vector<1x32xf32>
    %296 = arith.addf %294, %295 : vector<1x32xf32>
    %297 = arith.mulf %35, %254 : vector<1x32xf32>
    %298 = arith.addf %296, %297 : vector<1x32xf32>
    %299 = arith.mulf %37, %285 : vector<1x32xf32>
    %300 = arith.addf %298, %299 : vector<1x32xf32>
    %301 = arith.subf %68, %300 : vector<1x32xf32>
    %302 = arith.mulf %23, %301 : vector<1x32xf32>
    %303 = arith.addf %23, %302 : vector<1x32xf32>
    %cst_130 = arith.constant 0.000000e+00 : f32
    %304 = vector.broadcast %cst_130 : f32 to vector<1x32xf32>
    %305 = arith.maximumf %303, %304 : vector<1x32xf32>
    %cst_131 = arith.constant dense<0.000000e+00> : vector<1xf32>
    %306 = vector.multi_reduction <add>, %305, %cst_131 [1] : vector<1x32xf32> to vector<1xf32>
    %307 = vector.shape_cast %306 : vector<1xf32> to vector<1x1xf32>
    %cst_132 = arith.constant 1.17549435E-38 : f32
    %308 = vector.broadcast %cst_132 : f32 to vector<1x1xf32>
    %309 = arith.maximumf %307, %308 : vector<1x1xf32>
    %cst_133 = arith.constant 1.000000e+00 : f32
    %310 = vector.broadcast %cst_133 : f32 to vector<1x1xf32>
    %311 = arith.divf %310, %309 : vector<1x1xf32>
    %312 = vector.broadcast %311 : vector<1x1xf32> to vector<1x32xf32>
    %313 = arith.mulf %305, %312 : vector<1x32xf32>
    %c0_134 = arith.constant 0 : index
    %c0_135 = arith.constant 0 : index
    %c0_136 = arith.constant 0 : index
    %314 = vector.load %arg4[%c0_134, %c0_135, %c0_136] : memref<1x8x32xf32, #tpu.memory_space<vmem>>, vector<1x1x32xf32>
    %315 = vector.shape_cast %314 : vector<1x1x32xf32> to vector<1x32xf32>
    %316 = vector.shape_cast %313 : vector<1x32xf32> to vector<1x1x32xf32>
    tpu.vector_store %arg4[%c0_134, %c0_135, %c0_136], %316 {strides = array<i32>} : memref<1x8x32xf32, #tpu.memory_space<vmem>>, vector<1x1x32xf32>,
    %317 = arith.subf %99, %300 : vector<1x32xf32>
    %318 = arith.mulf %25, %317 : vector<1x32xf32>
    %319 = arith.addf %25, %318 : vector<1x32xf32>
    %cst_137 = arith.constant 0.000000e+00 : f32
    %320 = vector.broadcast %cst_137 : f32 to vector<1x32xf32>
    %321 = arith.maximumf %319, %320 : vector<1x32xf32>
    %cst_138 = arith.constant dense<0.000000e+00> : vector<1xf32>
    %322 = vector.multi_reduction <add>, %321, %cst_138 [1] : vector<1x32xf32> to vector<1xf32>
    %323 = vector.shape_cast %322 : vector<1xf32> to vector<1x1xf32>
    %cst_139 = arith.constant 1.17549435E-38 : f32
    %324 = vector.broadcast %cst_139 : f32 to vector<1x1xf32>
    %325 = arith.maximumf %323, %324 : vector<1x1xf32>
    %cst_140 = arith.constant 1.000000e+00 : f32
    %326 = vector.broadcast %cst_140 : f32 to vector<1x1xf32>
    %327 = arith.divf %326, %325 : vector<1x1xf32>
    %328 = vector.broadcast %327 : vector<1x1xf32> to vector<1x32xf32>
    %329 = arith.mulf %321, %328 : vector<1x32xf32>
    %c0_141 = arith.constant 0 : index
    %c1_142 = arith.constant 1 : index
    %c0_143 = arith.constant 0 : index
    %330 = vector.load %arg4[%c0_141, %c1_142, %c0_143] : memref<1x8x32xf32, #tpu.memory_space<vmem>>, vector<1x1x32xf32>
    %331 = vector.shape_cast %330 : vector<1x1x32xf32> to vector<1x32xf32>
    %332 = vector.shape_cast %329 : vector<1x32xf32> to vector<1x1x32xf32>
    tpu.vector_store %arg4[%c0_141, %c1_142, %c0_143], %332 {strides = array<i32>} : memref<1x8x32xf32, #tpu.memory_space<vmem>>, vector<1x1x32xf32>,
    %333 = arith.subf %130, %300 : vector<1x32xf32>
    %334 = arith.mulf %27, %333 : vector<1x32xf32>
    %335 = arith.addf %27, %334 : vector<1x32xf32>
    %cst_144 = arith.constant 0.000000e+00 : f32
    %336 = vector.broadcast %cst_144 : f32 to vector<1x32xf32>
    %337 = arith.maximumf %335, %336 : vector<1x32xf32>
    %cst_145 = arith.constant dense<0.000000e+00> : vector<1xf32>
    %338 = vector.multi_reduction <add>, %337, %cst_145 [1] : vector<1x32xf32> to vector<1xf32>
    %339 = vector.shape_cast %338 : vector<1xf32> to vector<1x1xf32>
    %cst_146 = arith.constant 1.17549435E-38 : f32
    %340 = vector.broadcast %cst_146 : f32 to vector<1x1xf32>
    %341 = arith.maximumf %339, %340 : vector<1x1xf32>
    %cst_147 = arith.constant 1.000000e+00 : f32
    %342 = vector.broadcast %cst_147 : f32 to vector<1x1xf32>
    %343 = arith.divf %342, %341 : vector<1x1xf32>
    %344 = vector.broadcast %343 : vector<1x1xf32> to vector<1x32xf32>
    %345 = arith.mulf %337, %344 : vector<1x32xf32>
    %c0_148 = arith.constant 0 : index
    %c2_149 = arith.constant 2 : index
    %c0_150 = arith.constant 0 : index
    %346 = vector.load %arg4[%c0_148, %c2_149, %c0_150] : memref<1x8x32xf32, #tpu.memory_space<vmem>>, vector<1x1x32xf32>
    %347 = vector.shape_cast %346 : vector<1x1x32xf32> to vector<1x32xf32>
    %348 = vector.shape_cast %345 : vector<1x32xf32> to vector<1x1x32xf32>
    tpu.vector_store %arg4[%c0_148, %c2_149, %c0_150], %348 {strides = array<i32>} : memref<1x8x32xf32, #tpu.memory_space<vmem>>, vector<1x1x32xf32>,
    %349 = arith.subf %161, %300 : vector<1x32xf32>
    %350 = arith.mulf %29, %349 : vector<1x32xf32>
    %351 = arith.addf %29, %350 : vector<1x32xf32>
    %cst_151 = arith.constant 0.000000e+00 : f32
    %352 = vector.broadcast %cst_151 : f32 to vector<1x32xf32>
    %353 = arith.maximumf %351, %352 : vector<1x32xf32>
    %cst_152 = arith.constant dense<0.000000e+00> : vector<1xf32>
    %354 = vector.multi_reduction <add>, %353, %cst_152 [1] : vector<1x32xf32> to vector<1xf32>
    %355 = vector.shape_cast %354 : vector<1xf32> to vector<1x1xf32>
    %cst_153 = arith.constant 1.17549435E-38 : f32
    %356 = vector.broadcast %cst_153 : f32 to vector<1x1xf32>
    %357 = arith.maximumf %355, %356 : vector<1x1xf32>
    %cst_154 = arith.constant 1.000000e+00 : f32
    %358 = vector.broadcast %cst_154 : f32 to vector<1x1xf32>
    %359 = arith.divf %358, %357 : vector<1x1xf32>
    %360 = vector.broadcast %359 : vector<1x1xf32> to vector<1x32xf32>
    %361 = arith.mulf %353, %360 : vector<1x32xf32>
    %c0_155 = arith.constant 0 : index
    %c3_156 = arith.constant 3 : index
    %c0_157 = arith.constant 0 : index
    %362 = vector.load %arg4[%c0_155, %c3_156, %c0_157] : memref<1x8x32xf32, #tpu.memory_space<vmem>>, vector<1x1x32xf32>
    %363 = vector.shape_cast %362 : vector<1x1x32xf32> to vector<1x32xf32>
    %364 = vector.shape_cast %361 : vector<1x32xf32> to vector<1x1x32xf32>
    tpu.vector_store %arg4[%c0_155, %c3_156, %c0_157], %364 {strides = array<i32>} : memref<1x8x32xf32, #tpu.memory_space<vmem>>, vector<1x1x32xf32>,
    %365 = arith.subf %192, %300 : vector<1x32xf32>
    %366 = arith.mulf %31, %365 : vector<1x32xf32>
    %367 = arith.addf %31, %366 : vector<1x32xf32>
    %cst_158 = arith.constant 0.000000e+00 : f32
    %368 = vector.broadcast %cst_158 : f32 to vector<1x32xf32>
    %369 = arith.maximumf %367, %368 : vector<1x32xf32>
    %cst_159 = arith.constant dense<0.000000e+00> : vector<1xf32>
    %370 = vector.multi_reduction <add>, %369, %cst_159 [1] : vector<1x32xf32> to vector<1xf32>
    %371 = vector.shape_cast %370 : vector<1xf32> to vector<1x1xf32>
    %cst_160 = arith.constant 1.17549435E-38 : f32
    %372 = vector.broadcast %cst_160 : f32 to vector<1x1xf32>
    %373 = arith.maximumf %371, %372 : vector<1x1xf32>
    %cst_161 = arith.constant 1.000000e+00 : f32
    %374 = vector.broadcast %cst_161 : f32 to vector<1x1xf32>
    %375 = arith.divf %374, %373 : vector<1x1xf32>
    %376 = vector.broadcast %375 : vector<1x1xf32> to vector<1x32xf32>
    %377 = arith.mulf %369, %376 : vector<1x32xf32>
    %c0_162 = arith.constant 0 : index
    %c4_163 = arith.constant 4 : index
    %c0_164 = arith.constant 0 : index
    %378 = vector.load %arg4[%c0_162, %c4_163, %c0_164] : memref<1x8x32xf32, #tpu.memory_space<vmem>>, vector<1x1x32xf32>
    %379 = vector.shape_cast %378 : vector<1x1x32xf32> to vector<1x32xf32>
    %380 = vector.shape_cast %377 : vector<1x32xf32> to vector<1x1x32xf32>
    tpu.vector_store %arg4[%c0_162, %c4_163, %c0_164], %380 {strides = array<i32>} : memref<1x8x32xf32, #tpu.memory_space<vmem>>, vector<1x1x32xf32>,
    %381 = arith.subf %223, %300 : vector<1x32xf32>
    %382 = arith.mulf %33, %381 : vector<1x32xf32>
    %383 = arith.addf %33, %382 : vector<1x32xf32>
    %cst_165 = arith.constant 0.000000e+00 : f32
    %384 = vector.broadcast %cst_165 : f32 to vector<1x32xf32>
    %385 = arith.maximumf %383, %384 : vector<1x32xf32>
    %cst_166 = arith.constant dense<0.000000e+00> : vector<1xf32>
    %386 = vector.multi_reduction <add>, %385, %cst_166 [1] : vector<1x32xf32> to vector<1xf32>
    %387 = vector.shape_cast %386 : vector<1xf32> to vector<1x1xf32>
    %cst_167 = arith.constant 1.17549435E-38 : f32
    %388 = vector.broadcast %cst_167 : f32 to vector<1x1xf32>
    %389 = arith.maximumf %387, %388 : vector<1x1xf32>
    %cst_168 = arith.constant 1.000000e+00 : f32
    %390 = vector.broadcast %cst_168 : f32 to vector<1x1xf32>
    %391 = arith.divf %390, %389 : vector<1x1xf32>
    %392 = vector.broadcast %391 : vector<1x1xf32> to vector<1x32xf32>
    %393 = arith.mulf %385, %392 : vector<1x32xf32>
    %c0_169 = arith.constant 0 : index
    %c5_170 = arith.constant 5 : index
    %c0_171 = arith.constant 0 : index
    %394 = vector.load %arg4[%c0_169, %c5_170, %c0_171] : memref<1x8x32xf32, #tpu.memory_space<vmem>>, vector<1x1x32xf32>
    %395 = vector.shape_cast %394 : vector<1x1x32xf32> to vector<1x32xf32>
    %396 = vector.shape_cast %393 : vector<1x32xf32> to vector<1x1x32xf32>
    tpu.vector_store %arg4[%c0_169, %c5_170, %c0_171], %396 {strides = array<i32>} : memref<1x8x32xf32, #tpu.memory_space<vmem>>, vector<1x1x32xf32>,
    %397 = arith.subf %254, %300 : vector<1x32xf32>
    %398 = arith.mulf %35, %397 : vector<1x32xf32>
    %399 = arith.addf %35, %398 : vector<1x32xf32>
    %cst_172 = arith.constant 0.000000e+00 : f32
    %400 = vector.broadcast %cst_172 : f32 to vector<1x32xf32>
    %401 = arith.maximumf %399, %400 : vector<1x32xf32>
    %cst_173 = arith.constant dense<0.000000e+00> : vector<1xf32>
    %402 = vector.multi_reduction <add>, %401, %cst_173 [1] : vector<1x32xf32> to vector<1xf32>
    %403 = vector.shape_cast %402 : vector<1xf32> to vector<1x1xf32>
    %cst_174 = arith.constant 1.17549435E-38 : f32
    %404 = vector.broadcast %cst_174 : f32 to vector<1x1xf32>
    %405 = arith.maximumf %403, %404 : vector<1x1xf32>
    %cst_175 = arith.constant 1.000000e+00 : f32
    %406 = vector.broadcast %cst_175 : f32 to vector<1x1xf32>
    %407 = arith.divf %406, %405 : vector<1x1xf32>
    %408 = vector.broadcast %407 : vector<1x1xf32> to vector<1x32xf32>
    %409 = arith.mulf %401, %408 : vector<1x32xf32>
    %c0_176 = arith.constant 0 : index
    %c6_177 = arith.constant 6 : index
    %c0_178 = arith.constant 0 : index
    %410 = vector.load %arg4[%c0_176, %c6_177, %c0_178] : memref<1x8x32xf32, #tpu.memory_space<vmem>>, vector<1x1x32xf32>
    %411 = vector.shape_cast %410 : vector<1x1x32xf32> to vector<1x32xf32>
    %412 = vector.shape_cast %409 : vector<1x32xf32> to vector<1x1x32xf32>
    tpu.vector_store %arg4[%c0_176, %c6_177, %c0_178], %412 {strides = array<i32>} : memref<1x8x32xf32, #tpu.memory_space<vmem>>, vector<1x1x32xf32>,
    %413 = arith.subf %285, %300 : vector<1x32xf32>
    %414 = arith.mulf %37, %413 : vector<1x32xf32>
    %415 = arith.addf %37, %414 : vector<1x32xf32>
    %cst_179 = arith.constant 0.000000e+00 : f32
    %416 = vector.broadcast %cst_179 : f32 to vector<1x32xf32>
    %417 = arith.maximumf %415, %416 : vector<1x32xf32>
    %cst_180 = arith.constant dense<0.000000e+00> : vector<1xf32>
    %418 = vector.multi_reduction <add>, %417, %cst_180 [1] : vector<1x32xf32> to vector<1xf32>
    %419 = vector.shape_cast %418 : vector<1xf32> to vector<1x1xf32>
    %cst_181 = arith.constant 1.17549435E-38 : f32
    %420 = vector.broadcast %cst_181 : f32 to vector<1x1xf32>
    %421 = arith.maximumf %419, %420 : vector<1x1xf32>
    %cst_182 = arith.constant 1.000000e+00 : f32
    %422 = vector.broadcast %cst_182 : f32 to vector<1x1xf32>
    %423 = arith.divf %422, %421 : vector<1x1xf32>
    %424 = vector.broadcast %423 : vector<1x1xf32> to vector<1x32xf32>
    %425 = arith.mulf %417, %424 : vector<1x32xf32>
    %c0_183 = arith.constant 0 : index
    %c7_184 = arith.constant 7 : index
    %c0_185 = arith.constant 0 : index
    %426 = vector.load %arg4[%c0_183, %c7_184, %c0_185] : memref<1x8x32xf32, #tpu.memory_space<vmem>>, vector<1x1x32xf32>
    %427 = vector.shape_cast %426 : vector<1x1x32xf32> to vector<1x32xf32>
    %428 = vector.shape_cast %425 : vector<1x32xf32> to vector<1x1x32xf32>
    tpu.vector_store %arg4[%c0_183, %c7_184, %c0_185], %428 {strides = array<i32>} : memref<1x8x32xf32, #tpu.memory_space<vmem>>, vector<1x1x32xf32>,
    return
  }
  func.func @transform_0(%arg0: i32) -> (i32, i32, i32) {
    %c0_i32 = arith.constant 0 : i32
    %c0_i32_0 = arith.constant 0 : i32
    %c0_i32_1 = arith.constant 0 : i32
    return %arg0, %c0_i32, %c0_i32_0 : i32, i32, i32
  }
  func.func @transform_1(%arg0: i32) -> (i32, i32) {
    %c0_i32 = arith.constant 0 : i32
    %c0_i32_0 = arith.constant 0 : i32
    %c0_i32_1 = arith.constant 0 : i32
    return %c0_i32, %c0_i32_0 : i32, i32
  }
  func.func @transform_2(%arg0: i32) -> (i32, i32) {
    %c0_i32 = arith.constant 0 : i32
    %c0_i32_0 = arith.constant 0 : i32
    %c0_i32_1 = arith.constant 0 : i32
    return %c0_i32, %c0_i32_0 : i32, i32
  }
  func.func @transform_3(%arg0: i32) -> (i32, i32, i32) {
    %c0_i32 = arith.constant 0 : i32
    %c0_i32_0 = arith.constant 0 : i32
    %c0_i32_1 = arith.constant 0 : i32
    return %arg0, %c0_i32, %c0_i32_0 : i32, i32, i32
  }
}

</mosaic_0001>

<bundles_post_ra>
// kernel: tpu_custom_call.1
= control target key start
LH: loop header
LB: loop body
LE: loop exit
PB: predicated region body
PF: predicated region fallthrough
CT: control target
= control target key end

     0   :  { %s2025_s0 = inlined_call_operand.hbm [shape: f32[2,8,32], index: 0, kind: input, shape index: {}]   ;;  %s2026_s1 = inlined_call_operand.hbm [shape: f32[32,32], index: 1, kind: input, shape index: {}]   ;;  %s2027_s2 = inlined_call_operand.hbm [shape: f32[8,8], index: 2, kind: input, shape index: {}]   ;;  %s2028_s3 = inlined_call_operand.hbm [shape: f32[2,8,32], index: 3, kind: output, shape index: {}]  }
   0x1   :  { %2100 = sst [smem:[#allocation76_spill]] %s2025_s0 }
   0x2   :  { %2101 = sst [smem:[#allocation77_spill]] %s2026_s1 }
   0x3   :  { %2102 = sst [smem:[#allocation78_spill]] %s2027_s2 }
   0x4   :  { %2103 = sst [smem:[#allocation79_spill]] %s2028_s3 }
   0x5   :  { %8 = vsyncpa [#allocation3], 0 }
   0x6   :  { %10 = vsyncpa [#allocation3 + $0x1], 0 }
   0x7   :  { %11 = vsyncpa [#allocation7], 0 }
   0x8   :  { %12 = vsyncpa [#allocation5], 0 }
   0x9   :  { %13 = vsyncpa [#allocation4], 0 }
   0xa   :  { %15 = vsyncpa [#allocation4 + $0x1], 0  ;;  %s1367_s12 = smov 0   ;;  %s1369_s13 = smov 0  }
   0xb   :  { %s1371_s14 = smov 0   ;;  %s1373_s15 = smov 0  }
   0xc LB: > { %2104 = sst [smem:[#allocation14_spill]] %s1325_s12  ;;  %s1388_s16 = sadd.s32 4294967295, %s1337_s15   ;;  %s1337_s15 = sphi %s1373_s15, %s2276_s15   ;;  %s1333_s14 = sphi %s1371_s14, %s2279_s14   ;;  %s1329_s13 = sphi %s1369_s13, %s2278_s13   ;;  %s1325_s12 = sphi %s1367_s12, %s2277_s12  }
   0xd   : > { %2105 = sst [smem:[#allocation15_spill]] %s1329_s13  ;;  %s1015_s17 = sadd.s32 4294967294, %s1337_s15  }
   0xe   : > { %2106 = sst [smem:[#allocation16_spill]] %s1333_s14  ;;  %p41_p0 = scmp.ne.s32.totalorder %s1329_s13, %s1325_s12 }
   0xf   : > { %2107 = sst [smem:[#allocation17_spill]] %s1337_s15  ;;  %p2029_p1 = scmp.eq.s32.totalorder %s1388_s16, 0 }
  0x10   : > { %2108 = sst [smem:[#allocation18_spill]] %s1388_s16  ;;  %p113_p3 = scmp.eq.s32.totalorder %s1015_s17, 1 }
  0x11   : > { %p1397_p4 = por %p2029_p1, %p41_p0  ;;  %p1016_p5 = scmp.ge.s32.totalorder %s1337_s15, 1 }
  0x12   : > { %p1402_p6 = por %p113_p3, %p41_p0  ;;  %p120_p7 = scmp.lt.s32.totalorder %s1337_s15, 3 }
  0x13   : > { %s2109_s18 = scalar_select %p1397_p4, 1, 0 }
  0x14   : > { %s2110_s19 = scalar_select %p1402_p6, 1, 0 }
  0x15   : > { %p1407_p8 = pnand %p1016_p5, %p120_p7  ;;  %s1339_s21 = smov [#allocation6]  }
  0x16   : > { %2111 = sst [smem:[#allocation19_spill]] %s2110_s19  ;;  %s132_s22 = sshll.u32 %s1339_s21, 4  ;;  %s133_s22 = int_to_ptr.vmem [resolvable:$true] %s132_s22 }
  0x17   : > { %s2112_s20 = scalar_select %p1407_p8, 1, 0 }
  0x18   : > { %p1123_p9 = pneg %p1407_p8  ;;  %s1421_s24 = sadd.s32 1, %s1337_s15  }
  0x19   : > { %2114 = sst [smem:[#allocation20_spill]] %s1421_s24  ;;  %s25_s25 = ssub.s32 %s1337_s15, %s1421_s24 }
  0x1a   : > { %p1416_p11 = pnand %p1123_p9, %p2029_p1  ;;  %s1211_s26 = scalar_lea.vmem %s133_s22, 512 }
  0x1b   : > { %p1212_p13 = scmp.ne.s32.totalorder %s133_s22, %s1211_s26  ;;  %p1219_p5 = scmp.lt.s32.totalorder %s133_s22, %s133_s22 }
  0x1c   : > { %p1202_p12 = pneg %p1416_p11  ;;  %p1220_p7 = scmp.lt.s32.totalorder %s1211_s26, %s1211_s26 }
  0x1e   : > { %p1214_p0 = pnand %p1212_p13, %p1202_p12  ;;  %p1221_p2 = por %p1220_p7, %p1219_p5 }
  0x20   : > { %p1215_p3 = pneg %p1214_p0 }
  0x22   : > { %p1222_p10 = pnand %p1221_p2, %p1215_p3 }
  0x24   : > { %1225 = shalt.err (!%p1222_p10)
}
  0x25   : > { %s1340_s27 = smov 128   ;;  %s1341_s28 = smov 8  }
  0x26   : > { %s2115_s1 = sld [smem:[#allocation77_spill]]  ;;  %s1342_s4 = smov [#allocation8]  }
  0x27   : > { %s2116_s2 = sld [smem:[#allocation78_spill]]  ;;  %p26_p2 = scmp.eq.s32.totalorder %s25_s25, 0 }
  0x28   : > { %s28_s7 = sadd.s32 1, %s1333_s14  ;;  %p35_p9 = scmp.ne.s32.totalorder %s1333_s14, %s1329_s13 }
  0x29   : > { %p36_p10 = scmp.eq.s32.totalorder %s1337_s15, 0  ;;  %p2118_p13 = scmp.eq.s32.totalorder %s1388_s16, 1 }
  0x2a   : > { %s1442_s8 = scalar_select %p26_p2, %s1333_s14, %s28_s7  }
  0x2b   : > { %p37_p12 = por %p36_p10, %p35_p9  ;;  %p1446_p0 = por %p2118_p13, %p35_p9 }
  0x2c   : > { %1126 = dma.hbm_to_vmem [thread:$0]  (!%p1416_p11), %s2115_s1, 512, %s133_s22, [#allocation7], %s1340_s27, %s1340_s27, %s1341_s28  }
  0x2d   : > { %1129 = dma.hbm_to_smem (!%p1416_p11), %s2116_s2, 128, %s1342_s4, [#allocation5]  }
  0x2e   : > { %2117 = sst [smem:[#allocation21_spill]] %s1442_s8  ;;  %p1140_p3 = scmp.lt.s32.totalorder %s1337_s15, 2 }
  0x2f   : > { %s2119_s9 = scalar_select %p1446_p0, 1, 0 }
  0x30   : > { %s155_s10 = sand.u32 1, %s1333_s14   ;;  %s1021_s17 = sshll.u32 %s1337_s15, 7 }
  0x31   : > { %2120 = sst [smem:[#allocation22_spill]] %s2119_s9  ;;  %s1020_s11 = sshll.u32 %s155_s10, 3 }
  0x32   : > { %s2121_s0 = sld [smem:[#allocation76_spill]]  ;;  %s159_s25 = scalar_lea.vmem [#allocation2], %s1020_s11 }
  0x33   : > { %s166_s26 = sshll.u32 %s159_s25, 4  ;;  %p1458_p11 = pnand %p1140_p3, %p37_p12  ;;  %s167_s26 = int_to_ptr.vmem [resolvable:$true] %s166_s26 }
  0x34   : > { %s156_s28 = scalar_lea.sflag [#allocation3], %s155_s10 }
  0x35   : > { %p1239_p7 = pneg %p1458_p11 }
  0x38   : > { %s1456_s23 = scalar_lea.hbm %s2121_s0, %s1021_s17  ;;  %s1242_s5 = scalar_lea.hbm %s2121_s0, 256 }
  0x39   : > { %s1237_s29 = scalar_lea.hbm %s1456_s23, 128  ;;  %p1243_p10 = scmp.lt.s32.totalorder %s1456_s23, %s2121_s0 }
  0x3a   : > { %p1238_p5 = scmp.ne.s32.totalorder %s1456_s23, %s1237_s29  ;;  %p1244_p12 = scmp.lt.s32.totalorder %s1242_s5, %s1237_s29 }
  0x3c   : > { %p1240_p2 = pnand %p1239_p7, %p1238_p5  ;;  %p1245_p13 = por %p1244_p12, %p1243_p10 }
  0x3e   : > { %p1241_p9 = pneg %p1240_p2 }
  0x40   : > { %p1246_p3 = pnand %p1245_p13, %p1241_p9 }
  0x42   : > { %1249 = shalt.err (!%p1246_p3)
}
  0x43   : > { %s1250_s11 = scalar_lea.vmem %s167_s26, 128  ;;  %s1343_s10 = smov [#allocation2]  }
  0x44   : > { %p1251_p1 = scmp.ne.s32.totalorder %s167_s26, %s1250_s11  ;;  %s1255_s17 = sshll.u32 %s1343_s10, 4  ;;  %s1256_s17 = int_to_ptr.vmem [resolvable:$false] %s1255_s17 }
  0x45   : > { %s1257_s21 = scalar_lea.vmem %s1256_s17, 256  ;;  %p1258_p5 = scmp.lt.s32.totalorder %s167_s26, %s1256_s17 }
  0x46   : > { %p1253_p6 = pnand %p1251_p1, %p1239_p7  ;;  %p1259_p2 = scmp.lt.s32.totalorder %s1257_s21, %s1250_s11 }
  0x48   : > { %p1254_p0 = pneg %p1253_p6  ;;  %p1260_p4 = por %p1259_p2, %p1258_p5 }
  0x4a   : > { %p1261_p8 = pnand %p1260_p4, %p1254_p0 }
  0x4c   : > { %1264 = shalt.err (!%p1261_p8)
}
  0x4d   : > { %1133 = dma.hbm_to_vmem [thread:$0]  (!%p1458_p11), %s1456_s23, 128, %s167_s26, %s156_s28  }
  0x4e   : > { %p2123_p9 = scmp.ne.s32.totalorder %s2112_s20, 0 }
  0x50   : > { %175 = sbr.rel (%p2123_p9) target bundleno = 735 (0x2df), region = 32 }
  0x55   : > { %s1479_s22 = sand.u32 1, %s1329_s13   ;;  %p2125_p1 = scmp.ne.s32.totalorder %s2109_s18, 0 }
  0x56   : > { %2124 = sst [smem:[#allocation23_spill]] %s1479_s22  ;;  %s2033_s25 = sshll.u32 %s1479_s22, 3 }
  0x57   : > { %s178_s29 = scalar_lea.sflag [#allocation3], %s1479_s22  ;;  %s181_s30 = scalar_lea.vmem [#allocation2], %s2033_s25 }
  0x58   : > { %1308 = dma.done.wait (%p2125_p1), %s178_s29, 128  }
  0x59   : > { %1310 = vsyncadd (%p2125_p1), %s178_s29, 4294967168  ;;  %p2126_p4 = scmp.eq.s32.totalorder %s1388_s16, 0 }
  0x5b   : > { %1312 = dma.done.wait (%p2126_p4), [#allocation7], 512   ;;  %p2127_p6 = pmov %p2126_p4 }
  0x5c   : > { %p2128_p8 = pmov %p2126_p4 }
  0x5d   : > { %1314 = vsyncadd (%p2127_p6), [#allocation7], 4294966784 }
  0x5e   : > { %1316 = dma.done.wait (%p2128_p8), [#allocation5], 128   ;;  %p2129_p0 = pmov %p2126_p4 }
  0x60   : > { %1318 = vsyncadd (%p2129_p0), [#allocation5], 4294967168 }
  0x61   : > { %194 = sfence }
  0x62   : > { %v217_v0 = vld [vmem:[#allocation6 + $0x18] sm:$0xff]  ;;  %v1344_v1 = vmov 0.0   ;;  %v216_v2 = vld [vmem:[#allocation6 + $0x10] sm:$0xff]  ;;  %vm1345_vm0 = vmmov 0   ;;  %v215_v3 = vld [vmem:[#allocation6 + $0x8] sm:$0xff]  ;;  %vm218_vm1 = vcmask 261120  }
  0x63   : > { %1100 = vmatprep.subr.mxu0 %v1344_v1  ;;  %1108 = vmatprep.mubr.msk.f32.mxu0 %vm1345_vm0, %v1344_v1  ;;  %v214_v4 = vld [vmem:[#allocation6] sm:$0xff]  ;;  %v213_v5 = vld [vmem:[%s181_s30] sm:$0xff]  ;;  %s1499_s18 = sld [smem:[#allocation8]]  ;;  %vm788_vm2 = vcmask 253952   ;;  %vm804_vm3 = vcmask 254977   ;;  %vm836_vm4 = vcmask 257027  }
  0x64   : > { %1101 = vmatpush3.msra.mxu0 %v217_v0  ;;  %s1501_s20 = sld [smem:[#allocation8 + $0x1]]  ;;  %vm820_vm5 = vcmask 256002   ;;  %vm868_vm6 = vcmask 259077   ;;  %vm852_vm7 = vcmask 258052   ;;  %vm900_vm8 = vcmask 261127  }
  0x65   : > { %1102 = vmatprep.subr.mxu0 %v1344_v1  ;;  %s1503_s23 = sld [smem:[#allocation8 + $0x2]]  ;;  %vm884_vm9 = vcmask 260102  }
  0x66   : > { %1103 = vmatpush3.msra.mxu0 %v216_v2  ;;  %s1505_s26 = sld [smem:[#allocation8 + $0x3]] }
  0x67   : > { %1104 = vmatprep.subr.mxu0 %v1344_v1  ;;  %s1507_s27 = sld [smem:[#allocation8 + $0x4]] }
  0x68   : > { %1105 = vmatpush3.msra.mxu0 %v215_v3  ;;  %s1509_s28 = sld [smem:[#allocation8 + $0x5]] }
  0x69   : > { %1106 = vmatprep.subr.mxu0 %v1344_v1  ;;  %2130 = sst [smem:[#allocation24_spill]] %s1499_s18  ;;  %v312_v23 = vstv %s1499_s18 }
  0x6a   : > { %1107 = vmatpush3.msra.mxu0 %v214_v4  ;;  %2131 = sst [smem:[#allocation25_spill]] %s1501_s20  ;;  %v315_v24 = vstv %s1501_s20 }
  0x6b   : > { %1109 = vmatmul.mubr.msk.f32.vlgmr.msra.gmra.mxu0 %vm218_vm1, %v213_v5  ;;  %2132 = sst [smem:[#allocation26_spill]] %s1503_s23  ;;  %v322_v25 = vstv %s1503_s23 }
  0x6c   : > { %2133 = sst [smem:[#allocation27_spill]] %s1505_s26  ;;  %v329_v26 = vstv %s1505_s26 }
  0x6d   : > { %2134 = sst [smem:[#allocation28_spill]] %s1507_s27  ;;  %v336_v27 = vstv %s1507_s27 }
  0x6e   : > { %2135 = sst [smem:[#allocation29_spill]] %s1509_s28  ;;  %v343_v28 = vstv %s1509_s28 }
  0x6f   : > { %s1511_s4 = sld [smem:[#allocation8 + $0x6]] }
  0x70   : > { %s1513_s5 = sld [smem:[#allocation8 + $0x7]] }
  0x71   : > { %s1515_s6 = sld [smem:[#allocation8 + $0x80]] }
  0x72   : > { %s1517_s7 = sld [smem:[#allocation8 + $0x81]] }
  0x73   : > { %s1519_s11 = sld [smem:[#allocation8 + $0x82]] }
  0x74   : > { %s1521_s10 = sld [smem:[#allocation8 + $0x83]] }
  0x75   : > { %2136 = sst [smem:[#allocation30_spill]] %s1511_s4  ;;  %v350_v29 = vstv %s1511_s4 }
  0x76   : > { %2137 = sst [smem:[#allocation31_spill]] %s1513_s5  ;;  %v357_v30 = vstv %s1513_s5 }
  0x77   : > { %2138 = sst [smem:[#allocation32_spill]] %s1515_s6  ;;  %v364_v31 = vstv %s1515_s6 }
  0x78   : > { %2139 = sst [smem:[#allocation33_spill]] %s1517_s7  ;;  %v367_v32 = vstv %s1517_s7 }
  0x79   : > { %2140 = sst [smem:[#allocation34_spill]] %s1519_s11  ;;  %v374_v33 = vstv %s1519_s11 }
  0x7a   : > { %2141 = sst [smem:[#allocation35_spill]] %s1521_s10  ;;  %v381_v34 = vstv %s1521_s10 }
  0x7b   : > { %s1523_s17 = sld [smem:[#allocation8 + $0x84]] }
  0x7c   : > { %s1525_s21 = sld [smem:[#allocation8 + $0x85]] }
  0x7d   : > { %s1527_s29 = sld [smem:[#allocation8 + $0x86]] }
  0x7e   : > { %s1529_s30 = sld [smem:[#allocation8 + $0x87]] }
  0x7f   : > { %s1531_s25 = sld [smem:[#allocation8 + $0x100]] }
  0x80   : > { %s1533_s0 = sld [smem:[#allocation8 + $0x101]] }
  0x81   : > { %2142 = sst [smem:[#allocation36_spill]] %s1523_s17  ;;  %v388_v35 = vstv %s1523_s17 }
  0x82   : > { %2143 = sst [smem:[#allocation37_spill]] %s1525_s21  ;;  %v395_v36 = vstv %s1525_s21 }
  0x83   : > { %2144 = sst [smem:[#allocation38_spill]] %s1527_s29  ;;  %v402_v37 = vstv %s1527_s29 }
  0x84   : > { %2145 = sst [smem:[#allocation39_spill]] %s1529_s30  ;;  %v409_v38 = vstv %s1529_s30 }
  0x85   : > { %2146 = sst [smem:[#allocation40_spill]] %s1531_s25  ;;  %v416_v39 = vstv %s1531_s25 }
  0x86   : > { %2147 = sst [smem:[#allocation41_spill]] %s1533_s0  ;;  %v419_v40 = vstv %s1533_s0 }
  0x87   : > { %s1535_s1 = sld [smem:[#allocation8 + $0x102]] }
  0x88   : > { %s1537_s2 = sld [smem:[#allocation8 + $0x103]] }
  0x89   : > { %s1539_s8 = sld [smem:[#allocation8 + $0x104]] }
  0x8a   : > { %s1541_s14 = sld [smem:[#allocation8 + $0x105]] }
  0x8b   : > { %s1543_s13 = sld [smem:[#allocation8 + $0x106]] }
  0x8c   : > { %s1545_s24 = sld [smem:[#allocation8 + $0x107]] }
  0x8d   : > { %2148 = sst [smem:[#allocation42_spill]] %s1535_s1  ;;  %v426_v41 = vstv %s1535_s1 }
  0x8e   : > { %2149 = sst [smem:[#allocation43_spill]] %s1537_s2  ;;  %v433_v42 = vstv %s1537_s2 }
  0x8f   : > { %2150 = sst [smem:[#allocation44_spill]] %s1539_s8  ;;  %v440_v43 = vstv %s1539_s8 }
  0x90   : > { %2151 = sst [smem:[#allocation45_spill]] %s1541_s14  ;;  %v447_v44 = vstv %s1541_s14 }
  0x91   : > { %2152 = sst [smem:[#allocation46_spill]] %s1543_s13 }
  0x92   : > { %2153 = sst [smem:[#allocation47_spill]] %s1545_s24 }
  0x93   : > { %s1547_s15 = sld [smem:[#allocation8 + $0x180]] }
  0x94   : > { %s1549_s19 = sld [smem:[#allocation8 + $0x181]] }
  0x95   : > { %s1551_s12 = sld [smem:[#allocation8 + $0x182]] }
  0x96   : > { %s1553_s3 = sld [smem:[#allocation8 + $0x183]] }
  0x97   : > { %s1555_s9 = sld [smem:[#allocation8 + $0x184]] }
  0x98   : > { %s1557_s16 = sld [smem:[#allocation8 + $0x185]] }
  0x99   : > { %2154 = sst [smem:[#allocation48_spill]] %s1547_s15  ;;  %v468_v47 = vstv %s1547_s15 }
  0x9a   : > { %2155 = sst [smem:[#allocation49_spill]] %s1549_s19 }
  0x9b   : > { %2156 = sst [smem:[#allocation50_spill]] %s1551_s12 }
  0x9c   : > { %2157 = sst [smem:[#allocation51_spill]] %s1553_s3 }
  0x9d   : > { %2158 = sst [smem:[#allocation52_spill]] %s1555_s9 }
  0x9e   : > { %2159 = sst [smem:[#allocation53_spill]] %s1557_s16 }
  0x9f   : > { %s1559_s22 = sld [smem:[#allocation8 + $0x186]] }
  0xa0   : > { %s1561_s13 = sld [smem:[#allocation8 + $0x187]] }
  0xa1   : > { %s1563_s24 = sld [smem:[#allocation8 + $0x200]] }
  0xa2   : > { %s1567_s19 = sld [smem:[#allocation8 + $0x201]] }
  0xa3   : > { %s1569_s12 = sld [smem:[#allocation8 + $0x202]] }
  0xa4   : > { %s1572_s3 = sld [smem:[#allocation8 + $0x203]] }
  0xa5   : > { %2160 = sst [smem:[#allocation54_spill]] %s1559_s22 }
  0xa6   : > { %2161 = sst [smem:[#allocation55_spill]] %s1561_s13 }
  0xa7   : > { %2162 = sst [smem:[#allocation56_spill]] %s1563_s24 }
  0xa8   : > { %2163 = sst [smem:[#allocation57_spill]] %s1567_s19 }
  0xa9   : > { %2164 = sst [smem:[#allocation58_spill]] %s1569_s12 }
  0xaa   : > { %2165 = sst [smem:[#allocation59_spill]] %s1572_s3 }
  0xab   : > { %s1574_s9 = sld [smem:[#allocation8 + $0x204]] }
  0xac   : > { %s1579_s22 = sld [smem:[#allocation8 + $0x205]] }
  0xad   : > { %s1581_s24 = sld [smem:[#allocation8 + $0x206]] }
  0xae   : > { %s1583_s13 = sld [smem:[#allocation8 + $0x207]] }
  0xaf   : > { %s1585_s19 = sld [smem:[#allocation8 + $0x280]] }
  0xb0   : > { %s1587_s12 = sld [smem:[#allocation8 + $0x281]] }
  0xb1   : > { %2166 = sst [smem:[#allocation60_spill]] %s1574_s9 }
  0xb2   : > { %2167 = sst [smem:[#allocation61_spill]] %s1579_s22 }
  0xb3   : > { %s1589_s3 = sld [smem:[#allocation8 + $0x282]]  ;;  %v558_v61 = vstv %s1581_s24 }
  0xb4   : > { %2168 = sst [smem:[#allocation62_spill]] %s1583_s13 }
  0xb5   : > { %2169 = sst [smem:[#allocation63_spill]] %s1585_s19  ;;  %v572_v63 = vstv %s1585_s19 }
  0xb6   : > { %2170 = sst [smem:[#allocation64_spill]] %s1587_s12 }
  0xb7   : > { %s1591_s9 = sld [smem:[#allocation8 + $0x283]] }
  0xb8   : > { %s1593_s16 = sld [smem:[#allocation8 + $0x284]] }
  0xb9   : > { %2171 = sst [smem:[#allocation65_spill]] %s1589_s3 }
  0xba   : > { %s1595_s22 = sld [smem:[#allocation8 + $0x285]] }
  0xbb   : > { %s1597_s13 = sld [smem:[#allocation8 + $0x286]] }
  0xbc   : > { %s1599_s12 = sld [smem:[#allocation8 + $0x287]] }
  0xbd   : > { %2172 = sst [smem:[#allocation66_spill]] %s1591_s9 }
  0xbe   : > { %2173 = sst [smem:[#allocation67_spill]] %s1593_s16 }
  0xbf   : > { %s1601_s3 = sld [smem:[#allocation8 + $0x300]] }
  0xc0   : > { %2174 = sst [smem:[#allocation68_spill]] %s1595_s22 }
  0xc1   : > { %2175 = sst [smem:[#allocation69_spill]] %s1597_s13 }
  0xc2   : > { %2176 = sst [smem:[#allocation70_spill]] %s1599_s12 }
  0xc3   : > { %s1603_s9 = sld [smem:[#allocation8 + $0x301]] }
  0xc4   : > { %s1605_s16 = sld [smem:[#allocation8 + $0x302]] }
  0xc5   : > { %2177 = sst [smem:[#allocation71_spill]] %s1601_s3 }
  0xc6   : > { %s1607_s22 = sld [smem:[#allocation8 + $0x303]] }
  0xc7   : > { %s1609_s13 = sld [smem:[#allocation8 + $0x304]] }
  0xc8   : > { %s1613_s3 = sld [smem:[#allocation8 + $0x305]] }
  0xc9   : > { %s1625_s18 = sld [smem:[#allocation8 + $0x307]] }
  0xca   : > { %s2181_s20 = sld [smem:[#allocation46_spill]] }
  0xcb   : > { %s2182_s23 = sld [smem:[#allocation47_spill]] }
  0xcc   : > { %2178 = sst [smem:[#allocation72_spill]] %s1607_s22 }
  0xcd   : > { %2179 = sst [smem:[#allocation73_spill]] %s1609_s13 }
  0xce   : > { %s1619_s22 = sld [smem:[#allocation8 + $0x306]] }
  0xcf   : > { %2180 = sst [smem:[#allocation74_spill]] %s1625_s18 }
  0xd0   : > { %s2183_s27 = sld [smem:[#allocation49_spill]]  ;;  %v454_v45 = vstv %s2181_s20 }
  0xd1   : > { %s1631_s28 = sld [smem:[#allocation8 + $0x380]]  ;;  %v461_v46 = vstv %s2182_s23 }
  0xd2   : > { %s2185_s26 = sld [smem:[#allocation50_spill]] }
  0xd3   : > { %s2186_s4 = sld [smem:[#allocation51_spill]] }
  0xd4   : > { %s2187_s5 = sld [smem:[#allocation52_spill]] }
  0xd5   : > { %s2188_s6 = sld [smem:[#allocation53_spill]] }
  0xd6   : > { %s1637_s7 = sld [smem:[#allocation8 + $0x381]]  ;;  %v471_v48 = vstv %s2183_s27 }
  0xd7   : > { %2184 = sst [smem:[#allocation75_spill]] %s1631_s28 }
  0xd8   : > { %s2189_s18 = sld [smem:[#allocation54_spill]]  ;;  %v478_v49 = vstv %s2185_s26 }
  0xd9   : > { %s2190_s11 = sld [smem:[#allocation55_spill]]  ;;  %v485_v50 = vstv %s2186_s4 }
  0xda   : > { %s2191_s10 = sld [smem:[#allocation56_spill]]  ;;  %v492_v51 = vstv %s2187_s5 }
  0xdb   : > { %s2192_s17 = sld [smem:[#allocation57_spill]]  ;;  %v499_v52 = vstv %s2188_s6 }
  0xdc   : > { %s1643_s21 = sld [smem:[#allocation8 + $0x382]] }
  0xdd   : > { %s2193_s28 = sld [smem:[#allocation58_spill]] }
  0xde   : > { %s2194_s29 = sld [smem:[#allocation59_spill]]  ;;  %v506_v53 = vstv %s2189_s18 }
  0xdf   : > { %s2195_s30 = sld [smem:[#allocation60_spill]]  ;;  %v513_v54 = vstv %s2190_s11 }
  0xe0   : > { %s2196_s25 = sld [smem:[#allocation61_spill]]  ;;  %v520_v55 = vstv %s2191_s10 }
  0xe1   : > { %s1649_s0 = sld [smem:[#allocation8 + $0x383]]  ;;  %v523_v56 = vstv %s2192_s17 }
  0xe2   : > { %s2198_s1 = sld [smem:[#allocation62_spill]] }
  0xe3   : > { %s2199_s8 = sld [smem:[#allocation64_spill]]  ;;  %v530_v57 = vstv %s2193_s28 }
  0xe4   : > { %s1655_s14 = sld [smem:[#allocation8 + $0x384]]  ;;  %v537_v58 = vstv %s2194_s29 }
  0xe5   : > { %s2200_s2 = sld [smem:[#allocation65_spill]]  ;;  %v544_v59 = vstv %s2195_s30 }
  0xe6   : > { %s2201_s20 = sld [smem:[#allocation66_spill]]  ;;  %v551_v60 = vstv %s2196_s25 }
  0xe7   : > { %2197 = sst [smem:[#allocation50_spill]] %s1649_s0 }
  0xe8   : > { %s2202_s23 = sld [smem:[#allocation67_spill]]  ;;  %v565_v62 = vstv %s2198_s1 }
  0xe9   : > { %s2203_s15 = sld [smem:[#allocation68_spill]]  ;;  %v575_v0 = vstv %s2199_s8 }
  0xea   : > { %s1661_s27 = sld [smem:[#allocation8 + $0x385]] }
  0xeb   : > { %s2204_s0 = sld [smem:[#allocation69_spill]]  ;;  %v582_v1 = vstv %s2200_s2 }
  0xec   : > { %s2205_s4 = sld [smem:[#allocation71_spill]]  ;;  %v589_v2 = vstv %s2201_s20 }
  0xed   : > { %s1667_s6 = sld [smem:[#allocation8 + $0x386]] }
  0xee   : > { %s2206_s18 = sld [smem:[#allocation72_spill]]  ;;  %v596_v3 = vstv %s2202_s23 }
  0xef   : > { %s1673_s11 = sld [smem:[#allocation8 + $0x387]]  ;;  %v603_v4 = vstv %s2203_s15 }
  0xf0   : > { %s2208_s29 = sld [smem:[#allocation75_spill]] }
  0xf1   : > { %s2213_s8 = sld [smem:[#allocation50_spill]] }
 0x12b   : > { %v288_v6 = vpop.f32.mrf.mxu0 }
 0x12c   : > { %v292_v7 = vmul.f32 %v288_v6, %v213_v5 }
 0x12d   : > { %v1110_v8 = vpop.f32.mrf.mxu0 }
 0x12e   : > { %v293_v9 = vsel %vm218_vm1, %v292_v7, 0.0  ;;  %v617_v7 = vstv %s1599_s12  ;;  %v624_v8 = vstv %s2205_s4 }
 0x12f   : > { %294 = vadd.xlane.f32.xlu0 %v293_v9  ;;  %v627_v9 = vstv %s1603_s9  ;;  %s2268_s9 = sld [smem:[#allocation22_spill]] }
 0x135   : > { %p2270_p7 = scmp.ne.s32.totalorder %s2268_s9, 0 }
 0x1b8   : > { %v295_v10 = vpop.xlane.xlu0 %294 }
 0x1b9   : > { %v296_v11 = vsub.f32 %v288_v6, %v295_v10  ;;  %v610_v6 = vstv %s2204_s0  ;;  %s2253_s0 = sld [smem:[#allocation74_spill]] }
 0x1bb   : > { %v297_v12 = vmul.f32 %v296_v11, %v213_v5  ;;  %v634_v11 = vstv %s1605_s16 }
 0x1bd   : > { %v1565_v13 = vadd.f32 %v297_v12, %v213_v5  ;;  %v641_v12 = vstv %s2206_s18 }
 0x1bf   : > { %v299_v14 = vmax.f32 %v1565_v13, 0.0 }
 0x1c1   : > { %v300_v15 = vsel %vm218_vm1, %v299_v14, 0.0 }
 0x1c2   : > { %v301_v16 = vrot.slane %v300_v15, 4 }
 0x1c4   : > { %v302_v17 = vadd.f32 %v301_v16, %v300_v15  ;;  %v648_v15 = vstv %s1609_s13 }
 0x1c6   : > { %v303_v18 = vrot.slane %v302_v17, 2 }
 0x1c8   : > { %v304_v19 = vadd.f32 %v303_v18, %v302_v17 }
 0x1ca   : > { %v305_v20 = vrot.slane %v304_v19, 1 }
 0x1cc   : > { %v306_v21 = vadd.f32 %v305_v20, %v304_v19 }
 0x1ce   : > { %v307_v22 = vmax.f32 %v306_v21, 1.1754944e-38 }
 0x1d0   : > { %1182 = vrcp.f32 %v307_v22 }
 0x1dd   : > { %v1183_v5 = vpop.eup %1182 }
 0x1de   : > { %v1685_v10 = vmul.f32 %v1183_v5, %v299_v14 }
 0x1e0   : > { %v316_v13 = vmul.f32 %v315_v24, %v1685_v10  ;;  %v323_v14 = vmul.f32 %v322_v25, %v1685_v10  ;;  %v330_v22 = vmul.f32 %v329_v26, %v1685_v10  ;;  %v337_v5 = vmul.f32 %v336_v27, %v1685_v10 }
 0x1e1   : > { %v313_v24 = vmul.f32 %v312_v23, %v1685_v10  ;;  %v344_v25 = vmul.f32 %v343_v28, %v1685_v10  ;;  %v351_v21 = vmul.f32 %v350_v29, %v1685_v10  ;;  %v1722_v26 = vmul.f32 %v357_v30, %v1685_v10 }
 0x1e2   : > { %v318_v17 = vrot.slane %v316_v13, 1  ;;  %v325_v16 = vrot.slane %v323_v14, 2  ;;  %v368_v23 = vmul.f32 %v367_v32, %v1685_v10  ;;  %v375_v28 = vmul.f32 %v374_v33, %v1685_v10 }
 0x1e3   : > { %v332_v29 = vrot.slane %v330_v22, 3  ;;  %v339_v13 = vrot.slane %v337_v5, 4  ;;  %v365_v30 = vmul.f32 %v364_v31, %v1685_v10  ;;  %v382_v19 = vmul.f32 %v381_v34, %v1685_v10 }
 0x1e4   : > { %v320_v18 = vadd.f32 %v318_v17, %v313_v24  ;;  %v346_v14 = vrot.slane %v344_v25, 5  ;;  %v353_v24 = vrot.slane %v351_v21, 6  ;;  %v370_v32 = vrot.slane %v368_v23, 1 }
 0x1e5   : > { %v360_v27 = vrot.slane %v1722_v26, 7  ;;  %v389_v33 = vmul.f32 %v388_v35, %v1685_v10  ;;  %v396_v22 = vmul.f32 %v395_v36, %v1685_v10  ;;  %v403_v31 = vmul.f32 %v402_v37, %v1685_v10 }
 0x1e6   : > { %v327_v17 = vadd.f32 %v325_v16, %v320_v18  ;;  %v372_v34 = vadd.f32 %v370_v32, %v365_v30  ;;  %v377_v20 = vrot.slane %v375_v28, 2  ;;  %v420_v16 = vmul.f32 %v419_v40, %v1685_v10 }
 0x1e7   : > { %v384_v18 = vrot.slane %v382_v19, 3  ;;  %v410_v21 = vmul.f32 %v409_v38, %v1685_v10  ;;  %v427_v35 = vmul.f32 %v426_v41, %v1685_v10  ;;  %v434_v36 = vmul.f32 %v433_v42, %v1685_v10 }
 0x1e8   : > { %v334_v5 = vadd.f32 %v332_v29, %v327_v17  ;;  %v379_v25 = vadd.f32 %v377_v20, %v372_v34  ;;  %v417_v26 = vmul.f32 %v416_v39, %v1685_v10  ;;  %v422_v40 = vrot.slane %v420_v16, 1 }
 0x1e9   : > { %v391_v19 = vrot.slane %v389_v33, 4  ;;  %v398_v23 = vrot.slane %v396_v22, 5  ;;  %v405_v38 = vrot.slane %v403_v31, 6  ;;  %v441_v41 = vmul.f32 %v440_v43, %v1685_v10 }
 0x1ea   : > { %v341_v37 = vadd.f32 %v339_v13, %v334_v5  ;;  %v386_v28 = vadd.f32 %v384_v18, %v379_v25  ;;  %v424_v29 = vadd.f32 %v422_v40, %v417_v26  ;;  %v429_v42 = vrot.slane %v427_v35, 2 }
 0x1eb   : > { %v448_v20 = vmul.f32 %v447_v44, %v1685_v10  ;;  %v436_v13 = vrot.slane %v434_v36, 3  ;;  %v455_v39 = vmul.f32 %v454_v45, %v1685_v10  ;;  %v472_v30 = vmul.f32 %v471_v48, %v1685_v10 }
 0x1ec   : > { %v479_v17 = vmul.f32 %v478_v49, %v1685_v10  ;;  %v348_v32 = vadd.f32 %v346_v14, %v341_v37  ;;  %v393_v33 = vadd.f32 %v391_v19, %v386_v28  ;;  %v431_v43 = vadd.f32 %v429_v42, %v424_v29 }
 0x1ed   : > { %v462_v22 = vmul.f32 %v461_v46, %v1685_v10  ;;  %v469_v44 = vmul.f32 %v468_v47, %v1685_v10  ;;  %v474_v31 = vrot.slane %v472_v30, 1  ;;  %v486_v45 = vmul.f32 %v485_v50, %v1685_v10 }
 0x1ee   : > { %v493_v48 = vmul.f32 %v492_v51, %v1685_v10  ;;  %v400_v5 = vadd.f32 %v398_v23, %v393_v33  ;;  %v412_v49 = vrot.slane %v410_v21, 7  ;;  %v438_v14 = vadd.f32 %v436_v13, %v431_v43 }
 0x1ef   : > { %v443_v34 = vrot.slane %v441_v41, 4  ;;  %v450_v16 = vrot.slane %v448_v20, 5  ;;  %v457_v46 = vrot.slane %v455_v39, 6  ;;  %v476_v18 = vadd.f32 %v474_v31, %v469_v44 }
 0x1f0   : > { %v481_v35 = vrot.slane %v479_v17, 2  ;;  %v355_v47 = vadd.f32 %v353_v24, %v348_v32  ;;  %v464_v37 = vrot.slane %v462_v22, 7  ;;  %v500_v50 = vmul.f32 %v499_v52, %v1685_v10 }
 0x1f1   : > { %v445_v36 = vadd.f32 %v443_v34, %v438_v14  ;;  %v488_v21 = vrot.slane %v486_v45, 3  ;;  %v495_v25 = vrot.slane %v493_v48, 4  ;;  %v524_v26 = vmul.f32 %v523_v56, %v1685_v10 }
 0x1f2   : > { %v483_v51 = vadd.f32 %v481_v35, %v476_v18  ;;  %v407_v40 = vadd.f32 %v405_v38, %v400_v5  ;;  %v507_v23 = vmul.f32 %v506_v53, %v1685_v10  ;;  %v531_v24 = vmul.f32 %v530_v57, %v1685_v10 }
 0x1f3   : > { %v452_v19 = vadd.f32 %v450_v16, %v445_v36  ;;  %v521_v52 = vmul.f32 %v520_v55, %v1685_v10  ;;  %v526_v28 = vrot.slane %v524_v26, 1  ;;  %v538_v29 = vmul.f32 %v537_v58, %v1685_v10 }
 0x1f4   : > { %v490_v41 = vadd.f32 %v488_v21, %v483_v51  ;;  %v1809_v56 = vadd.f32 %v360_v27, %v355_v47  ;;  %v502_v38 = vrot.slane %v500_v50, 5  ;;  %v514_v53 = vmul.f32 %v513_v54, %v1685_v10 }
 0x1f5   : > { %v545_v57 = vmul.f32 %v544_v59, %v1685_v10  ;;  %v459_v42 = vadd.f32 %v457_v46, %v452_v19  ;;  %v528_v13 = vadd.f32 %v526_v28, %v521_v52  ;;  %v533_v55 = vrot.slane %v531_v24, 2 }
 0x1f6   : > { %v497_v20 = vadd.f32 %v495_v25, %v490_v41  ;;  %v1817_v39 = vadd.f32 %v412_v49, %v407_v40  ;;  %v509_v58 = vrot.slane %v507_v23, 6  ;;  %v552_v27 = vmul.f32 %v551_v60, %v1685_v10 }
 0x1f7   : > { %v559_v54 = vmul.f32 %v558_v61, %v1685_v10  ;;  %v535_v17 = vadd.f32 %v533_v55, %v528_v13  ;;  %v540_v59 = vrot.slane %v538_v29, 3  ;;  %v576_v32 = vmul.f32 %v575_v0, %v1685_v10 }
 0x1f8   : > { %v504_v30 = vadd.f32 %v502_v38, %v497_v20  ;;  %v516_v33 = vrot.slane %v514_v53, 7  ;;  %v547_v43 = vrot.slane %v545_v57, 4  ;;  %v583_v22 = vmul.f32 %v582_v1, %v1685_v10 }
 0x1f9   : > { %v590_v60 = vmul.f32 %v589_v2, %v1685_v10  ;;  %v1834_v44 = vadd.f32 %v464_v37, %v459_v42  ;;  %v542_v61 = vadd.f32 %v540_v59, %v535_v17  ;;  %v573_v31 = vmul.f32 %v572_v63, %v1685_v10 }
 0x1fa   : > { %v578_v45 = vrot.slane %v576_v32, 1  ;;  %v554_v0 = vrot.slane %v552_v27, 5  ;;  %v561_v48 = vrot.slane %v559_v54, 6  ;;  %v566_v5 = vmul.f32 %v565_v62, %v1685_v10 }
 0x1fb   : > { %v597_v1 = vmul.f32 %v596_v3, %v1685_v10  ;;  %v511_v2 = vadd.f32 %v509_v58, %v504_v30  ;;  %v549_v49 = vadd.f32 %v547_v43, %v542_v61  ;;  %v585_v34 = vrot.slane %v583_v22, 2 }
 0x1fc   : > { %v580_v14 = vadd.f32 %v578_v45, %v573_v31  ;;  %v592_v16 = vrot.slane %v590_v60, 3  ;;  %v604_v63 = vmul.f32 %v603_v4, %v1685_v10  ;;  %v611_v46 = vmul.f32 %v610_v6, %v1685_v10 }
 0x1fd   : > { %v628_v62 = vmul.f32 %v627_v9, %v1685_v10  ;;  %v556_v18 = vadd.f32 %v554_v0, %v549_v49  ;;  %v635_v3 = vmul.f32 %v634_v11, %v1685_v10  ;;  %v642_v47 = vmul.f32 %v641_v12, %v1685_v10 }
 0x1fe   : > { %v587_v35 = vadd.f32 %v585_v34, %v580_v14  ;;  %v568_v36 = vrot.slane %v566_v5, 7  ;;  %v599_v37 = vrot.slane %v597_v1, 4  ;;  %v625_v4 = vmul.f32 %v624_v8, %v1685_v10 }
 0x1ff   : > { %v630_v6 = vrot.slane %v628_v62, 1  ;;  %v1863_v50 = vadd.f32 %v516_v33, %v511_v2  ;;  %v618_v51 = vmul.f32 %v617_v7, %v1685_v10  ;;  %v649_v11 = vmul.f32 %v648_v15, %v1685_v10 }
 0x200   : > { %v594_v9 = vadd.f32 %v592_v16, %v587_v35  ;;  %v606_v12 = vrot.slane %v604_v63, 5  ;;  %v613_v21 = vrot.slane %v611_v46, 6  ;;  %v637_v26 = vrot.slane %v635_v3, 2 }
 0x201   : > { %v632_v25 = vadd.f32 %v630_v6, %v625_v4  ;;  %v563_v8 = vadd.f32 %v561_v48, %v556_v18  ;;  %v644_v19 = vrot.slane %v642_v47, 3  ;;  %v2254_v23 = vstv %s1613_s3  ;;  %s2265_s3 = sld [smem:[#allocation23_spill]] }
 0x202   : > { %v601_v40 = vadd.f32 %v599_v37, %v594_v9  ;;  %v656_v24 = vmul.f32 %v2254_v23, %v1685_v10  ;;  %v2255_v7 = vstv %s1619_s22  ;;  %v2256_v15 = vstv %s1637_s7 }
 0x203   : > { %v639_v41 = vadd.f32 %v637_v26, %v632_v25  ;;  %v663_v52 = vmul.f32 %v2255_v7, %v1685_v10  ;;  %v680_v28 = vmul.f32 %v2256_v15, %v1685_v10  ;;  %v2257_v29 = vstv %s1643_s21 }
 0x204   : > { %v687_v38 = vmul.f32 %v2257_v29, %v1685_v10  ;;  %v608_v53 = vadd.f32 %v606_v12, %v601_v40  ;;  %v620_v57 = vrot.slane %v618_v51, 7  ;;  %v651_v42 = vrot.slane %v649_v11, 4 }
 0x205   : > { %v2258_v20 = vstv %s2253_s0  ;;  %v646_v55 = vadd.f32 %v644_v19, %v639_v41  ;;  %v2259_v58 = vstv %s2208_s29  ;;  %v682_v54 = vrot.slane %v680_v28, 1  ;;  %s1346_s29 = smov [#allocation9]  }
 0x206   : > { %v670_v13 = vmul.f32 %v2258_v20, %v1685_v10  ;;  %v677_v27 = vmul.f32 %v2259_v58, %v1685_v10  ;;  %v2260_v30 = vstv %s2213_s8  ;;  %v1892_v59 = vadd.f32 %v568_v36, %v563_v8  ;;  %s2267_s8 = sld [smem:[#allocation18_spill]]  ;;  %s1269_s2 = sshll.u32 %s1346_s29, 4  ;;  %s1270_s2 = int_to_ptr.vmem [resolvable:$false] %s1269_s2 }
 0x207   : > { %v694_v17 = vmul.f32 %v2260_v30, %v1685_v10  ;;  %v615_v32 = vadd.f32 %v613_v21, %v608_v53  ;;  %v658_v33 = vrot.slane %v656_v24, 5  ;;  %v2261_v43 = vstv %s1655_s14  ;;  %s2266_s14 = sshll.u32 %s2265_s3, 3  ;;  %s1271_s26 = scalar_lea.vmem %s1270_s2, 256 }
 0x208   : > { %v701_v22 = vmul.f32 %v2261_v43, %v1685_v10  ;;  %v653_v60 = vadd.f32 %v651_v42, %v646_v55  ;;  %v665_v61 = vrot.slane %v663_v52, 6  ;;  %v684_v31 = vadd.f32 %v682_v54, %v677_v27  ;;  %s212_s16 = scalar_lea.vmem [#allocation9], %s2266_s14 }
 0x209   : > { %v689_v45 = vrot.slane %v687_v38, 2  ;;  %v622_v0 = vadd.f32 %v620_v57, %v615_v32  ;;  %v672_v48 = vrot.slane %v670_v13, 7  ;;  %v2262_v5 = vstv %s1661_s27  ;;  %s923_s18 = sshll.u32 %s212_s16, 4  ;;  %s924_s18 = int_to_ptr.vmem [resolvable:$true] %s923_s18 }
 0x20a   : > { %v708_v1 = vmul.f32 %v2262_v5, %v1685_v10  ;;  %v729_v2 = vrot.slane %v1817_v39, 7  ;;  %v660_v49 = vadd.f32 %v658_v33, %v653_v60  ;;  %v696_v34 = vrot.slane %v694_v17, 3  ;;  %s1265_s21 = scalar_lea.vmem %s924_s18, 128  ;;  %p1272_p13 = scmp.lt.s32.totalorder %s924_s18, %s1270_s2 }
 0x20b   : > { %v691_v14 = vadd.f32 %v689_v45, %v684_v31  ;;  %v737_v16 = vrot.slane %v1834_v44, 6  ;;  %v703_v63 = vrot.slane %v701_v22, 4  ;;  %v745_v62 = vrot.slane %v1863_v50, 5  ;;  %p1266_p11 = scmp.ne.s32.totalorder %s924_s18, %s1265_s21  ;;  %p1273_p3 = scmp.lt.s32.totalorder %s1271_s26, %s1265_s21 }
 0x20c   : > { %v731_v46 = vmul.f32 %v729_v2, %v1685_v10  ;;  %v753_v18 = vrot.slane %v1892_v59, 4  ;;  %v667_v35 = vadd.f32 %v665_v61, %v660_v49  ;;  %v2263_v47 = vstv %s1667_s6  ;;  %s1092_s22 = sshll.u32 %s2267_s8, 7  ;;  %s2269_s6 = sld [smem:[#allocation79_spill]] }
 0x20d   : > { %v698_v3 = vadd.f32 %v696_v34, %v691_v14  ;;  %v715_v36 = vmul.f32 %v2263_v47, %v1685_v10  ;;  %v739_v37 = vmul.f32 %v737_v16, %v1685_v10  ;;  %v727_v4 = vmul.f32 %v1809_v56, %v1685_v10  ;;  %p1267_p10 = pnand %p1266_p11, %p2270_p7  ;;  %p1274_p5 = por %p1273_p3, %p1272_p13 }
 0x20e   : > { %v733_v6 = vrot.slane %v731_v46, 1  ;;  %v747_v9 = vmul.f32 %v745_v62, %v1685_v10  ;;  %v761_v51 = vrot.slane %v622_v0, 3  ;;  %v674_v11 = vadd.f32 %v672_v48, %v667_v35 }
 0x20f   : > { %v705_v12 = vadd.f32 %v703_v63, %v698_v3  ;;  %v710_v21 = vrot.slane %v708_v1, 5  ;;  %v2264_v25 = vstv %s1673_s11  ;;  %v741_v40 = vrot.slane %v739_v37, 2  ;;  %s910_s11 = scalar_lea.sflag [#allocation4], %s2265_s3  ;;  %p1268_p12 = pneg %p1267_p10 }
 0x210   : > { %v722_v26 = vmul.f32 %v2264_v25, %v1685_v10  ;;  %v735_v8 = vadd.f32 %v733_v6, %v727_v4  ;;  %v755_v19 = vmul.f32 %v753_v18, %v1685_v10  ;;  %v717_v24 = vrot.slane %v715_v36, 6 }
 0x211   : > { %v712_v23 = vadd.f32 %v710_v21, %v705_v12  ;;  %v769_v41 = vrot.slane %v674_v11, 2  ;;  %v749_v52 = vrot.slane %v747_v9, 3  ;;  %v763_v15 = vmul.f32 %v761_v51, %v1685_v10  ;;  %p1275_p2 = pnand %p1274_p5, %p1268_p12 }
 0x212   : > { %v743_v7 = vadd.f32 %v741_v40, %v735_v8  ;;  %v724_v29 = vrot.slane %v722_v26, 7  ;;  %v757_v53 = vrot.slane %v755_v19, 4  ;;  %s921_s7 = scalar_lea.hbm %s2269_s6, %s1092_s22 }
 0x213   : > { %v719_v28 = vadd.f32 %v717_v24, %v712_v23  ;;  %v771_v57 = vmul.f32 %v769_v41, %v1685_v10  ;;  %v765_v13 = vrot.slane %v763_v15, 5 }
 0x214   : > { %v751_v38 = vadd.f32 %v749_v52, %v743_v7 }
 0x215   : > { %v726_v42 = vadd.f32 %v724_v29, %v719_v28  ;;  %v773_v27 = vrot.slane %v771_v57, 6 }
 0x216   : > { %v759_v20 = vadd.f32 %v757_v53, %v751_v38 }
 0x217   : > { %v777_v55 = vrot.slane %v726_v42, 1 }
 0x218   : > { %v767_v58 = vadd.f32 %v765_v13, %v759_v20 }
 0x219   : > { %v779_v54 = vmul.f32 %v777_v55, %v1685_v10 }
 0x21a   : > { %v775_v30 = vadd.f32 %v773_v27, %v767_v58 }
 0x21b   : > { %v781_v17 = vrot.slane %v779_v54, 7 }
 0x21d   : > { %v783_v32 = vadd.f32 %v781_v17, %v775_v30 }
 0x21f   : > { %v784_v33 = vsub.f32 %v1809_v56, %v783_v32  ;;  %v797_v43 = vsub.f32 %v1817_v39, %v783_v32  ;;  %v829_v22 = vsub.f32 %v1863_v50, %v783_v32  ;;  %v813_v60 = vsub.f32 %v1834_v44, %v783_v32 }
 0x220   : > { %v861_v61 = vsub.f32 %v622_v0, %v783_v32  ;;  %v845_v31 = vsub.f32 %v1892_v59, %v783_v32  ;;  %v893_v45 = vsub.f32 %v726_v42, %v783_v32  ;;  %v877_v48 = vsub.f32 %v674_v11, %v783_v32 }
 0x221   : > { %v785_v5 = vmul.f32 %v784_v33, %v1685_v10  ;;  %v799_v1 = vrot.slane %v797_v43, 7  ;;  %v831_v2 = vrot.slane %v829_v22, 5  ;;  %v815_v49 = vrot.slane %v813_v60, 6 }
 0x222   : > { %v863_v14 = vrot.slane %v861_v61, 3  ;;  %v847_v34 = vrot.slane %v845_v31, 4  ;;  %v895_v16 = vrot.slane %v893_v45, 1  ;;  %v879_v63 = vrot.slane %v877_v48, 2 }
 0x223   : > { %v1926_v56 = vadd.f32 %v785_v5, %v1685_v10  ;;  %v801_v39 = vmul.f32 %v799_v1, %v1685_v10  ;;  %v833_v44 = vmul.f32 %v831_v2, %v1685_v10  ;;  %v817_v50 = vmul.f32 %v815_v49, %v1685_v10 }
 0x224   : > { %v865_v59 = vmul.f32 %v863_v14, %v1685_v10  ;;  %v849_v0 = vmul.f32 %v847_v34, %v1685_v10  ;;  %v897_v3 = vmul.f32 %v895_v16, %v1685_v10  ;;  %v881_v11 = vmul.f32 %v879_v63, %v1685_v10 }
 0x225   : > { %v787_v46 = vmax.f32 %v1926_v56, 0.0  ;;  %v1935_v62 = vadd.f32 %v801_v39, %v1685_v10  ;;  %v1938_v18 = vadd.f32 %v833_v44, %v1685_v10  ;;  %v1941_v35 = vadd.f32 %v817_v50, %v1685_v10 }
 0x226   : > { %v1950_v4 = vadd.f32 %v865_v59, %v1685_v10  ;;  %v1955_v51 = vadd.f32 %v849_v0, %v1685_v10  ;;  %v1963_v25 = vadd.f32 %v897_v3, %v1685_v10  ;;  %v1968_v40 = vadd.f32 %v881_v11, %v1685_v10 }
 0x227   : > { %v789_v47 = vsel %vm788_vm2, %v787_v46, 0.0  ;;  %v803_v36 = vmax.f32 %v1935_v62, 0.0  ;;  %v835_v37 = vmax.f32 %v1938_v18, 0.0  ;;  %v819_v9 = vmax.f32 %v1941_v35, 0.0 }
 0x228   : > { %790 = vadd.xlane.f32.xlu0 %v789_v47  ;;  %v867_v21 = vmax.f32 %v1950_v4, 0.0  ;;  %v851_v8 = vmax.f32 %v1955_v51, 0.0  ;;  %v899_v23 = vmax.f32 %v1963_v25, 0.0  ;;  %v883_v41 = vmax.f32 %v1968_v40, 0.0 }
 0x229   : > { %v805_v6 = vsel %vm804_vm3, %v803_v36, 0.0  ;;  %v837_v12 = vsel %vm836_vm4, %v835_v37, 0.0  ;;  %v821_v26 = vsel %vm820_vm5, %v819_v9, 0.0 }
 0x22a   : > { %806 = vadd.xlane.f32.xlu1 %v805_v6  ;;  %v869_v19 = vsel %vm868_vm6, %v867_v21, 0.0  ;;  %v853_v24 = vsel %vm852_vm7, %v851_v8, 0.0  ;;  %v901_v7 = vsel %vm900_vm8, %v899_v23, 0.0  ;;  %v885_v10 = vsel %vm884_vm9, %v883_v41, 0.0 }
 0x22c   : > { %838 = vadd.xlane.f32.xlu0 %v837_v12 }
 0x22e   : > { %822 = vadd.xlane.f32.xlu1 %v821_v26 }
 0x230   : > { %870 = vadd.xlane.f32.xlu0 %v869_v19 }
 0x232   : > { %854 = vadd.xlane.f32.xlu1 %v853_v24 }
 0x234   : > { %902 = vadd.xlane.f32.xlu0 %v901_v7 }
 0x236   : > { %886 = vadd.xlane.f32.xlu1 %v885_v10 }
 0x2b1   : > { %v791_v52 = vpop.xlane.xlu0 %790 }
 0x2b2   : > { %v792_v15 = vmax.f32 %v791_v52, 1.1754944e-38 }
 0x2b3   : > { %v807_v28 = vpop.xlane.xlu1 %806 }
 0x2b4   : > { %1184 = vrcp.f32 %v792_v15  ;;  %v808_v29 = vmax.f32 %v807_v28, 1.1754944e-38 }
 0x2b5   : > { %v839_v38 = vpop.xlane.xlu0 %838 }
 0x2b6   : > { %1186 = vrcp.f32 %v808_v29  ;;  %v840_v53 = vmax.f32 %v839_v38, 1.1754944e-38 }
 0x2b7   : > { %v823_v57 = vpop.xlane.xlu1 %822 }
 0x2b8   : > { %1188 = vrcp.f32 %v840_v53  ;;  %v824_v42 = vmax.f32 %v823_v57, 1.1754944e-38 }
 0x2b9   : > { %v871_v20 = vpop.xlane.xlu0 %870 }
 0x2ba   : > { %1190 = vrcp.f32 %v824_v42  ;;  %v872_v13 = vmax.f32 %v871_v20, 1.1754944e-38 }
 0x2bb   : > { %v855_v55 = vpop.xlane.xlu1 %854 }
 0x2bc   : > { %1192 = vrcp.f32 %v872_v13  ;;  %v856_v58 = vmax.f32 %v855_v55, 1.1754944e-38 }
 0x2bd   : > { %v903_v27 = vpop.xlane.xlu0 %902 }
 0x2be   : > { %1194 = vrcp.f32 %v856_v58  ;;  %v904_v54 = vmax.f32 %v903_v27, 1.1754944e-38 }
 0x2bf   : > { %v887_v30 = vpop.xlane.xlu1 %886 }
 0x2c0   : > { %1196 = vrcp.f32 %v904_v54  ;;  %v888_v17 = vmax.f32 %v887_v30, 1.1754944e-38 }
 0x2c1   : > { %v1185_v32 = vpop.eup %1184 }
 0x2c2   : > { %v795_v33 = vmul.f32 %v1185_v32, %v787_v46  ;;  %1198 = vrcp.f32 %v888_v17 }
 0x2c3   : > { %v1187_v43 = vpop.eup %1186 }
 0x2c4   : > { %796 = vst.msk [vmem:[%s212_s16] sm:$0x1] %vm788_vm2, %v795_v33  ;;  %v811_v22 = vmul.f32 %v1187_v43, %v803_v36 }
 0x2c5   : > { %v1189_v60 = vpop.eup %1188 }
 0x2c6   : > { %812 = vst.msk [vmem:[%s212_s16] sm:$0x2] %vm804_vm3, %v811_v22  ;;  %v843_v61 = vmul.f32 %v1189_v60, %v835_v37 }
 0x2c7   : > { %v1191_v31 = vpop.eup %1190 }
 0x2c8   : > { %844 = vst.msk [vmem:[%s212_s16] sm:$0x8] %vm836_vm4, %v843_v61  ;;  %v827_v45 = vmul.f32 %v1191_v31, %v819_v9 }
 0x2c9   : > { %v1193_v48 = vpop.eup %1192 }
 0x2ca   : > { %828 = vst.msk [vmem:[%s212_s16] sm:$0x4] %vm820_vm5, %v827_v45  ;;  %v875_v5 = vmul.f32 %v1193_v48, %v867_v21 }
 0x2cb   : > { %v1195_v1 = vpop.eup %1194 }
 0x2cc   : > { %876 = vst.msk [vmem:[%s212_s16] sm:$0x20] %vm868_vm6, %v875_v5  ;;  %v859_v2 = vmul.f32 %v1195_v1, %v851_v8 }
 0x2cd   : > { %v1197_v49 = vpop.eup %1196 }
 0x2ce   : > { %860 = vst.msk [vmem:[%s212_s16] sm:$0x10] %vm852_vm7, %v859_v2  ;;  %v907_v14 = vmul.f32 %v1197_v49, %v899_v23 }
 0x2cf   : > { %v1199_v34 = vpop.eup %1198 }
 0x2d0   : > { %908 = vst.msk [vmem:[%s212_s16] sm:$0x80] %vm900_vm8, %v907_v14  ;;  %v891_v16 = vmul.f32 %v1199_v34, %v883_v41 }
 0x2d2   : > { %892 = vst.msk [vmem:[%s212_s16] sm:$0x40] %vm884_vm9, %v891_v16 }
 0x2d3   : > { %1278 = shalt.err (!%p1275_p2)
}
 0x2d4   : > { %s1279_s20 = scalar_lea.hbm %s921_s7, 128  ;;  %s1283_s12 = scalar_lea.hbm %s2269_s6, 256 }
 0x2d5   : > { %p1280_p9 = scmp.ne.s32.totalorder %s921_s7, %s1279_s20  ;;  %p1284_p6 = scmp.lt.s32.totalorder %s921_s7, %s2269_s6 }
 0x2d6   : > { %p1285_p8 = scmp.lt.s32.totalorder %s1283_s12, %s1279_s20 }
 0x2d7   : > { %p1281_p1 = pnand %p1280_p9, %p2270_p7 }
 0x2d8   : > { %p1286_p0 = por %p1285_p8, %p1284_p6 }
 0x2d9   : > { %p1282_p4 = pneg %p1281_p1 }
 0x2db   : > { %p1287_p11 = pnand %p1286_p0, %p1282_p4 }
 0x2dd   : > { %1290 = shalt.err (!%p1287_p11)
}
 0x2de   : > { %1121 = dma.vmem_to_hbm [thread:$0]  (%p2270_p7), %s924_s18, 128, %s921_s7, %s910_s11  }
 0x2df PF: > { %s2271_s28 = sld [smem:[#allocation14_spill]] }
 0x2e0   : > { %s2272_s10 = sld [smem:[#allocation19_spill]] }
 0x2e1   : > { %s2273_s30 = sld [smem:[#allocation17_spill]] }
 0x2e5   : > { %s935_s1 = sand.u32 1, %s2271_s28  }
 0x2e6   : > { %p2274_p10 = scmp.ne.s32.totalorder %s2272_s10, 0  ;;  %s936_s19 = scalar_lea.sflag [#allocation4], %s935_s1 }
 0x2e7   : > { %p2275_p12 = scmp.ge.s32.totalorder %s2273_s30, 2 }
 0x2e9   : > { %p1135_p13 = pnand %p2275_p12, %p2274_p10 }
 0x2eb   : > { %p1136_p3 = pneg %p1135_p13 }
 0x2ed   : > { %1320 = dma.done.wait (%p1136_p3), %s936_s19, 128  }
 0x2ee   : > { %1322 = vsyncadd (%p1136_p3), %s936_s19, 4294967168  ;;  %s2276_s15 = sld [smem:[#allocation20_spill]] }
 0x2ef   : > { %s2277_s12 = sld [smem:[#allocation15_spill]] }
 0x2f0   : > { %s2278_s13 = sld [smem:[#allocation16_spill]] }
 0x2f1   : > { %s2279_s14 = sld [smem:[#allocation21_spill]] }
 0x2f4   : > { %p18_p5 = scmp.ge.s32.totalorder %s2276_s15, 4  }
 0x2f6   :  { %20 = sbr.rel (!%p18_p5) target bundleno = 12 (0xc), region = 86 }
 0x2fb   :  { %941 = vsyncpa [#allocation3], 1 }
 0x2fc   :  { %943 = vsyncpa [#allocation3 + $0x1], 1 }
 0x2fd   :  { %944 = vsyncpa [#allocation7], 1 }
 0x2fe   :  { %945 = vsyncpa [#allocation4], 1 }
 0x2ff   :  { %947 = vsyncpa [#allocation4 + $0x1], 1 }
 0x300   :  { %948 = vsyncpa [#allocation5], 1 }
 0x301   :  { %950 = vsyncpa [#allocation5 + $0x1], 1 }

</bundles_post_ra>
